<compile_context>
chip_gen: v5e
topology: v5e:2x2
jax: 0.10.0
libtpu: 0.0.40
codegen_flags: <defaults>
</compile_context>

<pallas_src>
import functools

import jax
import jax.numpy as jnp
from jax.experimental import pallas as pl
from jax.experimental.pallas import tpu as pltpu

LANE = 128
SUBLANE = 8


def _round_up(x, m):
    return (x + m - 1) // m * m


def _compiler_params(per_step_bytes):
    vmem_limit = int(min(48 * 1024 * 1024,
                         max(16 * 1024 * 1024, 4 * per_step_bytes)))
    return pltpu.CompilerParams(
        dimension_semantics=("parallel",),
        vmem_limit_bytes=vmem_limit,
    )


# --------------------------------------------------------------------------- #
# Pallas kernels
# --------------------------------------------------------------------------- #
def _conv_stats_kernel(p_ref, w_ref, z_ref, st_ref):
    """Folded conv GEMM (bf16 operands, f32 accumulate) + per-tile BN partials."""
    acc = jnp.dot(p_ref[...], w_ref[...], preferred_element_type=jnp.float32)
    z_ref[...] = acc
    cp = acc.shape[1]
    s = jnp.sum(acc, axis=0, keepdims=True)            # (1, Cp)
    sq = jnp.sum(acc * acc, axis=0, keepdims=True)     # (1, Cp)
    st_ref[...] = jnp.concatenate(
        [s, sq, jnp.zeros((SUBLANE - 2, cp), jnp.float32)], axis=0)[None]


def _make_bn_act_kernel(has_residual, apply_relu):
    """Normalize (pre-folded scale/shift), optional residual add, optional ReLU."""
    def kernel(*refs):
        if has_residual:
            z_ref, sc_ref, sh_ref, r_ref, o_ref = refs
        else:
            z_ref, sc_ref, sh_ref, o_ref = refs
        y = z_ref[...] * sc_ref[...] + sh_ref[...]
        if has_residual:
            y = y + r_ref[...]
        if apply_relu:
            y = jnp.maximum(y, 0.0)
        o_ref[...] = y
    return kernel


# --------------------------------------------------------------------------- #
# JAX glue: im2col with taps folded into the channel (contraction) axis
# --------------------------------------------------------------------------- #
def _im2col(x_nhwc, kh_kw, stride, padding):
    """Returns (N*Ho*Wo, KH*KW*Cin) patches (tap-major, channel-minor) + (Ho, Wo)."""
    KH, KW = kh_kw
    N, H, W, Cin = x_nhwc.shape
    Ho = (H + 2 * padding - KH) // stride + 1
    Wo = (W + 2 * padding - KW) // stride + 1
    xp = jnp.pad(x_nhwc, ((0, 0), (padding, padding), (padding, padding), (0, 0)))
    taps = []
    for kh in range(KH):
        for kw in range(KW):
            taps.append(jax.lax.slice(
                xp,
                (0, kh, kw, 0),
                (N, kh + (Ho - 1) * stride + 1, kw + (Wo - 1) * stride + 1, Cin),
                (1, stride, stride, 1)))
    patches = jnp.concatenate(taps, axis=-1).reshape(N * Ho * Wo, KH * KW * Cin)
    return patches, Ho, Wo


def _conv_bn(x_nhwc, w, gamma, beta, *, stride, padding, apply_relu,
             residual=None, tile_m=256, eps=1e-5, compute_dtype=jnp.bfloat16):
    """conv(KHxKW, stride, padding) + BN(batch stats) [+ residual] [+ relu]."""
    KH, KW, Cin, Cout = w.shape
    N = x_nhwc.shape[0]

    patches, Ho, Wo = _im2col(x_nhwc, (KH, KW), stride, padding)
    M, K = patches.shape

    Kp = _round_up(K, LANE)
    Cp = _round_up(Cout, LANE)
    TM = min(tile_m, _round_up(M, SUBLANE))
    Mp = _round_up(M, TM)
    n_tiles = Mp // TM

    # Pad to lane-dense shapes; zero-padded rows/channels contribute 0 to the
    # BN partial sums (the count below uses the real M), and padded output
    # rows/channels are sliced off at the end.
    patches_p = jnp.pad(patches, ((0, Mp - M), (0, Kp - K))).astype(compute_dtype)
    w_p = jnp.pad(w.reshape(K, Cout),
                  ((0, Kp - K), (0, Cp - Cout))).astype(compute_dtype)

    # ---- pass 1: conv GEMM + per-tile BN partials (grid over M, pipelined) ----
    bytes_p1 = 2 * (TM * Kp * 2 + Kp * Cp * 2 + TM * Cp * 4 + SUBLANE * Cp * 4)
    z, stats = pl.pallas_call(
        _conv_stats_kernel,
        grid=(n_tiles,),
        in_specs=[
            pl.BlockSpec((TM, Kp), lambda i: (i, 0)),        # patches tile
            pl.BlockSpec((Kp, Cp), lambda i: (0, 0)),        # weights (resident)
        ],
        out_specs=[
            pl.BlockSpec((TM, Cp), lambda i: (i, 0)),        # conv output tile
            pl.BlockSpec((1, SUBLANE, Cp), lambda i: (i, 0, 0)),  # partials
        ],
        out_shape=[
            jax.ShapeDtypeStruct((Mp, Cp), jnp.float32),
            jax.ShapeDtypeStruct((n_tiles, SUBLANE, Cp), jnp.float32),
        ],
        compiler_params=_compiler_params(bytes_p1),
    )(patches_p, w_p)

    # ---- tiny cross-tile reduction + fold gamma/beta into scale/shift (f32) ----
    cnt = jnp.float32(M)
    mean = jnp.sum(stats[:, 0, :], axis=0) / cnt
    var = jnp.maximum(jnp.sum(stats[:, 1, :], axis=0) / cnt - mean * mean, 0.0)
    gamma_p = jnp.pad(gamma.astype(jnp.float32), (0, Cp - Cout))
    beta_p = jnp.pad(beta.astype(jnp.float32), (0, Cp - Cout))
    inv = gamma_p * jax.lax.rsqrt(var + eps)
    scale = inv.reshape(1, Cp)
    shift = (beta_p - mean * inv).reshape(1, Cp)

    # ---- pass 2: normalize + residual + relu (mem-bound streaming, grid over M) ----
    has_res = residual is not None
    ins = [z, scale, shift]
    in_specs = [
        pl.BlockSpec((TM, Cp), lambda i: (i, 0)),
        pl.BlockSpec((1, Cp), lambda i: (0, 0)),
        pl.BlockSpec((1, Cp), lambda i: (0, 0)),
    ]
    if has_res:
        r = residual.reshape(M, Cout).astype(jnp.float32)
        r = jnp.pad(r, ((0, Mp - M), (0, Cp - Cout)))
        ins.append(r)
        in_specs.append(pl.BlockSpec((TM, Cp), lambda i: (i, 0)))

    bytes_p2 = 2 * ((2 + int(has_res)) * TM * Cp * 4 + 2 * Cp * 4)
    out = pl.pallas_call(
        _make_bn_act_kernel(has_res, apply_relu),
        grid=(n_tiles,),
        in_specs=in_specs,
        out_specs=pl.BlockSpec((TM, Cp), lambda i: (i, 0)),
        out_shape=jax.ShapeDtypeStruct((Mp, Cp), jnp.float32),
        compiler_params=_compiler_params(bytes_p2),
    )(*ins)

    return out[:M, :Cout].reshape(N, Ho, Wo, Cout)


# --------------------------------------------------------------------------- #
# ResidualBlock forward
# --------------------------------------------------------------------------- #
def residual_block_forward(x_nchw, params, *, stride, need_shortcut):
    x = jnp.transpose(x_nchw, (0, 2, 3, 1))  # NCHW -> NHWC

    # right branch: conv3x3(stride) + BN + ReLU
    h = _conv_bn(x, params["w1"], params["g1"], params["be1"],
                 stride=stride, padding=1, apply_relu=True)

    # shortcut branch
    if need_shortcut:
        sc = _conv_bn(x, params["ws"], params["gs"], params["bes"],
                      stride=stride, padding=0, apply_relu=False)
    else:
        if stride != 1 or params["w1"].shape[2] != params["w1"].shape[3]:
            raise ValueError("identity shortcut requires stride == 1 and Cin == Cout")
        sc = x  # identity (nn.Sequential())

    # right branch: conv3x3(stride=1) + BN, then += shortcut, then ReLU (fused in pass 2)
    out = _conv_bn(h, params["w2"], params["g2"], params["be2"],
                   stride=1, padding=1, apply_relu=True, residual=sc)

    return jnp.transpose(out, (0, 3, 1, 2))  # NHWC -> NCHW


# --------------------------------------------------------------------------- #
# Pure-JAX f32 reference (keeps the conv bias to show dropping it is a no-op)
# --------------------------------------------------------------------------- #
def _ref_conv_bn(x, w, b, gamma, beta, *, stride, padding, relu, residual=None,
                 eps=1e-5):
    y = jax.lax.conv_general_dilated(
        x, w, (stride, stride), [(padding, padding)] * 2,
        dimension_numbers=("NHWC", "HWIO", "NHWC"))
    y = y + b.reshape(1, 1, 1, -1)
    mean = jnp.mean(y, axis=(0, 1, 2), keepdims=True)
    var = jnp.mean((y - mean) ** 2, axis=(0, 1, 2), keepdims=True)
    y = (y - mean) * jax.lax.rsqrt(var + eps)
    y = y * gamma.reshape(1, 1, 1, -1) + beta.reshape(1, 1, 1, -1)
    if residual is not None:
        y = y + residual
    if relu:
        y = jnp.maximum(y, 0.0)
    return y


def _ref_forward(x_nchw, p, *, stride, need_shortcut):
    x = jnp.transpose(x_nchw, (0, 2, 3, 1))
    h = _ref_conv_bn(x, p["w1"], p["b1"], p["g1"], p["be1"],
                     stride=stride, padding=1, relu=True)
    sc = (_ref_conv_bn(x, p["ws"], p["bs"], p["gs"], p["bes"],
                       stride=stride, padding=0, relu=False)
          if need_shortcut else x)
    out = _ref_conv_bn(h, p["w2"], p["b2"], p["g2"], p["be2"],
                       stride=1, padding=1, relu=True, residual=sc)
    return jnp.transpose(out, (0, 3, 1, 2))


# --------------------------------------------------------------------------- #
# Deterministic parameter init
# --------------------------------------------------------------------------- #
def init_params(key, inchannels, outchannels, need_shortcut):
    ks = jax.random.split(key, 12)
    p = {
        "w1": 0.1 * jax.random.normal(ks[0], (3, 3, inchannels, outchannels), jnp.float32),
        "b1": 0.1 * jax.random.normal(ks[1], (outchannels,), jnp.float32),
        "g1": 1.0 + 0.1 * jax.random.normal(ks[2], (outchannels,), jnp.float32),
        "be1": 0.1 * jax.random.normal(ks[3], (outchannels,), jnp.float32),
        "w2": 0.1 * jax.random.normal(ks[4], (3, 3, outchannels, outchannels), jnp.float32),
        "b2": 0.1 * jax.random.normal(ks[5], (outchannels,), jnp.float32),
        "g2": 1.0 + 0.1 * jax.random.normal(ks[6], (outchannels,), jnp.float32),
        "be2": 0.1 * jax.random.normal(ks[7], (outchannels,), jnp.float32),
    }
    if need_shortcut:
        p.update({
            "ws": 0.1 * jax.random.normal(ks[8], (1, 1, inchannels, outchannels), jnp.float32),
            "bs": 0.1 * jax.random.normal(ks[9], (outchannels,), jnp.float32),
            "gs": 1.0 + 0.1 * jax.random.normal(ks[10], (outchannels,), jnp.float32),
            "bes": 0.1 * jax.random.normal(ks[11], (outchannels,), jnp.float32),
        })
    return p


if __name__ == "__main__":
    key = jax.random.PRNGKey(0)
    kx, kp, kx2, kp2 = jax.random.split(key, 4)

    # ---- config A: projection shortcut (conv1x1 + BN), matches the spec demo ----
    N, Cin, Cout, H, W = 2, 4, 8, 16, 16
    stride, need_shortcut = 1, True
    x = jax.random.normal(kx, (N, Cin, H, W), jnp.float32)  # NCHW (PyTorch convention)
    params = init_params(kp, Cin, Cout, need_shortcut)

    fwd = jax.jit(functools.partial(residual_block_forward,
                                    stride=stride, need_shortcut=need_shortcut))
    out = jax.block_until_ready(fwd(x, params))
    ref = _ref_forward(x, params, stride=stride, need_shortcut=need_shortcut)
    assert out.shape == (N, Cout, H // stride, W // stride), out.shape
    err = jnp.max(jnp.abs(out - ref))
    # bf16 GEMM operands -> tolerance appropriate for bfloat16 inputs
    assert jnp.allclose(out, ref, rtol=5e-2, atol=5e-2), f"max err {err}"

    # ---- config B: identity shortcut path (Cin == Cout, stride == 1) ----
    Cin2 = Cout2 = 8
    x2 = jax.random.normal(kx2, (N, Cin2, H, W), jnp.float32)
    params2 = init_params(kp2, Cin2, Cout2, need_shortcut=False)
    fwd2 = jax.jit(functools.partial(residual_block_forward,
                                     stride=1, need_shortcut=False))
    out2 = jax.block_until_ready(fwd2(x2, params2))
    ref2 = _ref_forward(x2, params2, stride=1, need_shortcut=False)
    err2 = jnp.max(jnp.abs(out2 - ref2))
    assert jnp.allclose(out2, ref2, rtol=5e-2, atol=5e-2), f"max err {err2}"

    print("KERNEL_OK")
</pallas_src>

<mosaic_0001>
module attributes {stable_mosaic.version = 11 : i64} {
  func.func @_conv_stats_kernel(%arg0: i32, %arg1: memref<256x128xbf16, #tpu.memory_space<vmem>>, %arg2: memref<128x128xbf16, #tpu.memory_space<vmem>>, %arg3: memref<256x128xf32, #tpu.memory_space<vmem>>, %arg4: memref<1x8x128xf32, #tpu.memory_space<vmem>>) attributes {dimension_semantics = [#tpu.dimension_semantics<parallel>], iteration_bounds = array<i64: 2>, scalar_prefetch = 0 : i64, scratch_operands = 0 : i64, tpu.core_type = #tpu.core_type<tc>, window_params = [{transform_indices = @transform_0, window_bounds = array<i64: 256, 128>}, {pipeline_mode = #tpu.pipeline_mode<synchronous>, transform_indices = @transform_1, window_bounds = array<i64: 128, 128>}, {transform_indices = @transform_2, window_bounds = array<i64: 256, 128>}, {transform_indices = @transform_3, window_bounds = array<i64: 1, 8, 128>}]} {
    %c0 = arith.constant 0 : index
    %c0_0 = arith.constant 0 : index
    %0 = vector.load %arg1[%c0, %c0_0] : memref<256x128xbf16, #tpu.memory_space<vmem>>, vector<256x128xbf16>
    %c0_1 = arith.constant 0 : index
    %c0_2 = arith.constant 0 : index
    %1 = vector.load %arg2[%c0_1, %c0_2] : memref<128x128xbf16, #tpu.memory_space<vmem>>, vector<128x128xbf16>
    %cst = arith.constant dense<0.000000e+00> : vector<256x128xf32>
    %2 = tpu.matmul %0, %1, %cst {dimension_numbers = #tpu.dot_dimension_numbers<[1], [0], [0], [1], [0, 0, 1, 1], [], []>} : vector<256x128xbf16>, vector<128x128xbf16>, vector<256x128xf32> -> vector<256x128xf32>
    %c0_3 = arith.constant 0 : index
    %c0_4 = arith.constant 0 : index
    %3 = vector.load %arg3[%c0_3, %c0_4] : memref<256x128xf32, #tpu.memory_space<vmem>>, vector<256x128xf32>
    tpu.vector_store %arg3[%c0_3, %c0_4], %2 {strides = array<i32>} : memref<256x128xf32, #tpu.memory_space<vmem>>, vector<256x128xf32>,
    %cst_5 = arith.constant dense<0.000000e+00> : vector<128xf32>
    %4 = vector.multi_reduction <add>, %2, %cst_5 [0] : vector<256x128xf32> to vector<128xf32>
    %5 = vector.shape_cast %4 : vector<128xf32> to vector<1x128xf32>
    %6 = arith.mulf %2, %2 : vector<256x128xf32>
    %cst_6 = arith.constant dense<0.000000e+00> : vector<128xf32>
    %7 = vector.multi_reduction <add>, %6, %cst_6 [0] : vector<256x128xf32> to vector<128xf32>
    %8 = vector.shape_cast %7 : vector<128xf32> to vector<1x128xf32>
    %cst_7 = arith.constant 0.000000e+00 : f32
    %9 = vector.broadcast %cst_7 : f32 to vector<6x128xf32>
    %10 = tpu.concatenate %5, %8, %9 in 0 : vector<1x128xf32>, vector<1x128xf32>, vector<6x128xf32> -> vector<8x128xf32>
    %11 = vector.shape_cast %10 : vector<8x128xf32> to vector<1x8x128xf32>
    %c0_8 = arith.constant 0 : index
    %c0_9 = arith.constant 0 : index
    %c0_10 = arith.constant 0 : index
    %12 = vector.load %arg4[%c0_8, %c0_9, %c0_10] : memref<1x8x128xf32, #tpu.memory_space<vmem>>, vector<1x8x128xf32>
    tpu.vector_store %arg4[%c0_8, %c0_9, %c0_10], %11 {strides = array<i32>} : memref<1x8x128xf32, #tpu.memory_space<vmem>>, vector<1x8x128xf32>,
    return
  }
  func.func @transform_0(%arg0: i32) -> (i32, i32) {
    %c0_i32 = arith.constant 0 : i32
    %c0_i32_0 = arith.constant 0 : i32
    return %arg0, %c0_i32 : i32, i32
  }
  func.func @transform_1(%arg0: i32) -> (i32, i32) {
    %c0_i32 = arith.constant 0 : i32
    %c0_i32_0 = arith.constant 0 : i32
    %c0_i32_1 = arith.constant 0 : i32
    return %c0_i32, %c0_i32_0 : i32, i32
  }
  func.func @transform_2(%arg0: i32) -> (i32, i32) {
    %c0_i32 = arith.constant 0 : i32
    %c0_i32_0 = arith.constant 0 : i32
    return %arg0, %c0_i32 : i32, i32
  }
  func.func @transform_3(%arg0: i32) -> (i32, i32, i32) {
    %c0_i32 = arith.constant 0 : i32
    %c0_i32_0 = arith.constant 0 : i32
    %c0_i32_1 = arith.constant 0 : i32
    return %arg0, %c0_i32, %c0_i32_0 : i32, i32, i32
  }
}

module attributes {stable_mosaic.version = 11 : i64} {
  func.func @kernel(%arg0: i32, %arg1: memref<256x128xf32, #tpu.memory_space<vmem>>, %arg2: memref<1x128xf32, #tpu.memory_space<vmem>>, %arg3: memref<1x128xf32, #tpu.memory_space<vmem>>, %arg4: memref<256x128xf32, #tpu.memory_space<vmem>>) attributes {dimension_semantics = [#tpu.dimension_semantics<parallel>], iteration_bounds = array<i64: 2>, scalar_prefetch = 0 : i64, scratch_operands = 0 : i64, tpu.core_type = #tpu.core_type<tc>, window_params = [{transform_indices = @transform_0, window_bounds = array<i64: 256, 128>}, {pipeline_mode = #tpu.pipeline_mode<synchronous>, transform_indices = @transform_1, window_bounds = array<i64: 1, 128>}, {pipeline_mode = #tpu.pipeline_mode<synchronous>, transform_indices = @transform_2, window_bounds = array<i64: 1, 128>}, {transform_indices = @transform_3, window_bounds = array<i64: 256, 128>}]} {
    %c0 = arith.constant 0 : index
    %c0_0 = arith.constant 0 : index
    %0 = vector.load %arg1[%c0, %c0_0] : memref<256x128xf32, #tpu.memory_space<vmem>>, vector<256x128xf32>
    %c0_1 = arith.constant 0 : index
    %c0_2 = arith.constant 0 : index
    %1 = vector.load %arg2[%c0_1, %c0_2] : memref<1x128xf32, #tpu.memory_space<vmem>>, vector<1x128xf32>
    %2 = vector.broadcast %1 : vector<1x128xf32> to vector<256x128xf32>
    %3 = arith.mulf %0, %2 : vector<256x128xf32>
    %c0_3 = arith.constant 0 : index
    %c0_4 = arith.constant 0 : index
    %4 = vector.load %arg3[%c0_3, %c0_4] : memref<1x128xf32, #tpu.memory_space<vmem>>, vector<1x128xf32>
    %5 = vector.broadcast %4 : vector<1x128xf32> to vector<256x128xf32>
    %6 = arith.addf %3, %5 : vector<256x128xf32>
    %cst = arith.constant 0.000000e+00 : f32
    %7 = vector.broadcast %cst : f32 to vector<256x128xf32>
    %8 = arith.maximumf %6, %7 : vector<256x128xf32>
    %c0_5 = arith.constant 0 : index
    %c0_6 = arith.constant 0 : index
    %9 = vector.load %arg4[%c0_5, %c0_6] : memref<256x128xf32, #tpu.memory_space<vmem>>, vector<256x128xf32>
    tpu.vector_store %arg4[%c0_5, %c0_6], %8 {strides = array<i32>} : memref<256x128xf32, #tpu.memory_space<vmem>>, vector<256x128xf32>,
    return
  }
  func.func @transform_0(%arg0: i32) -> (i32, i32) {
    %c0_i32 = arith.constant 0 : i32
    %c0_i32_0 = arith.constant 0 : i32
    return %arg0, %c0_i32 : i32, i32
  }
  func.func @transform_1(%arg0: i32) -> (i32, i32) {
    %c0_i32 = arith.constant 0 : i32
    %c0_i32_0 = arith.constant 0 : i32
    %c0_i32_1 = arith.constant 0 : i32
    return %c0_i32, %c0_i32_0 : i32, i32
  }
  func.func @transform_2(%arg0: i32) -> (i32, i32) {
    %c0_i32 = arith.constant 0 : i32
    %c0_i32_0 = arith.constant 0 : i32
    %c0_i32_1 = arith.constant 0 : i32
    return %c0_i32, %c0_i32_0 : i32, i32
  }
  func.func @transform_3(%arg0: i32) -> (i32, i32) {
    %c0_i32 = arith.constant 0 : i32
    %c0_i32_0 = arith.constant 0 : i32
    return %arg0, %c0_i32 : i32, i32
  }
}

module attributes {stable_mosaic.version = 11 : i64} {
  func.func @kernel(%arg0: i32, %arg1: memref<256x128xf32, #tpu.memory_space<vmem>>, %arg2: memref<1x128xf32, #tpu.memory_space<vmem>>, %arg3: memref<1x128xf32, #tpu.memory_space<vmem>>, %arg4: memref<256x128xf32, #tpu.memory_space<vmem>>) attributes {dimension_semantics = [#tpu.dimension_semantics<parallel>], iteration_bounds = array<i64: 2>, scalar_prefetch = 0 : i64, scratch_operands = 0 : i64, tpu.core_type = #tpu.core_type<tc>, window_params = [{transform_indices = @transform_0, window_bounds = array<i64: 256, 128>}, {pipeline_mode = #tpu.pipeline_mode<synchronous>, transform_indices = @transform_1, window_bounds = array<i64: 1, 128>}, {pipeline_mode = #tpu.pipeline_mode<synchronous>, transform_indices = @transform_2, window_bounds = array<i64: 1, 128>}, {transform_indices = @transform_3, window_bounds = array<i64: 256, 128>}]} {
    %c0 = arith.constant 0 : index
    %c0_0 = arith.constant 0 : index
    %0 = vector.load %arg1[%c0, %c0_0] : memref<256x128xf32, #tpu.memory_space<vmem>>, vector<256x128xf32>
    %c0_1 = arith.constant 0 : index
    %c0_2 = arith.constant 0 : index
    %1 = vector.load %arg2[%c0_1, %c0_2] : memref<1x128xf32, #tpu.memory_space<vmem>>, vector<1x128xf32>
    %2 = vector.broadcast %1 : vector<1x128xf32> to vector<256x128xf32>
    %3 = arith.mulf %0, %2 : vector<256x128xf32>
    %c0_3 = arith.constant 0 : index
    %c0_4 = arith.constant 0 : index
    %4 = vector.load %arg3[%c0_3, %c0_4] : memref<1x128xf32, #tpu.memory_space<vmem>>, vector<1x128xf32>
    %5 = vector.broadcast %4 : vector<1x128xf32> to vector<256x128xf32>
    %6 = arith.addf %3, %5 : vector<256x128xf32>
    %c0_5 = arith.constant 0 : index
    %c0_6 = arith.constant 0 : index
    %7 = vector.load %arg4[%c0_5, %c0_6] : memref<256x128xf32, #tpu.memory_space<vmem>>, vector<256x128xf32>
    tpu.vector_store %arg4[%c0_5, %c0_6], %6 {strides = array<i32>} : memref<256x128xf32, #tpu.memory_space<vmem>>, vector<256x128xf32>,
    return
  }
  func.func @transform_0(%arg0: i32) -> (i32, i32) {
    %c0_i32 = arith.constant 0 : i32
    %c0_i32_0 = arith.constant 0 : i32
    return %arg0, %c0_i32 : i32, i32
  }
  func.func @transform_1(%arg0: i32) -> (i32, i32) {
    %c0_i32 = arith.constant 0 : i32
    %c0_i32_0 = arith.constant 0 : i32
    %c0_i32_1 = arith.constant 0 : i32
    return %c0_i32, %c0_i32_0 : i32, i32
  }
  func.func @transform_2(%arg0: i32) -> (i32, i32) {
    %c0_i32 = arith.constant 0 : i32
    %c0_i32_0 = arith.constant 0 : i32
    %c0_i32_1 = arith.constant 0 : i32
    return %c0_i32, %c0_i32_0 : i32, i32
  }
  func.func @transform_3(%arg0: i32) -> (i32, i32) {
    %c0_i32 = arith.constant 0 : i32
    %c0_i32_0 = arith.constant 0 : i32
    return %arg0, %c0_i32 : i32, i32
  }
}

module attributes {stable_mosaic.version = 11 : i64} {
  func.func @kernel(%arg0: i32, %arg1: memref<256x128xf32, #tpu.memory_space<vmem>>, %arg2: memref<1x128xf32, #tpu.memory_space<vmem>>, %arg3: memref<1x128xf32, #tpu.memory_space<vmem>>, %arg4: memref<256x128xf32, #tpu.memory_space<vmem>>, %arg5: memref<256x128xf32, #tpu.memory_space<vmem>>) attributes {dimension_semantics = [#tpu.dimension_semantics<parallel>], iteration_bounds = array<i64: 2>, scalar_prefetch = 0 : i64, scratch_operands = 0 : i64, tpu.core_type = #tpu.core_type<tc>, window_params = [{transform_indices = @transform_0, window_bounds = array<i64: 256, 128>}, {pipeline_mode = #tpu.pipeline_mode<synchronous>, transform_indices = @transform_1, window_bounds = array<i64: 1, 128>}, {pipeline_mode = #tpu.pipeline_mode<synchronous>, transform_indices = @transform_2, window_bounds = array<i64: 1, 128>}, {transform_indices = @transform_3, window_bounds = array<i64: 256, 128>}, {transform_indices = @transform_4, window_bounds = array<i64: 256, 128>}]} {
    %c0 = arith.constant 0 : index
    %c0_0 = arith.constant 0 : index
    %0 = vector.load %arg1[%c0, %c0_0] : memref<256x128xf32, #tpu.memory_space<vmem>>, vector<256x128xf32>
    %c0_1 = arith.constant 0 : index
    %c0_2 = arith.constant 0 : index
    %1 = vector.load %arg2[%c0_1, %c0_2] : memref<1x128xf32, #tpu.memory_space<vmem>>, vector<1x128xf32>
    %2 = vector.broadcast %1 : vector<1x128xf32> to vector<256x128xf32>
    %3 = arith.mulf %0, %2 : vector<256x128xf32>
    %c0_3 = arith.constant 0 : index
    %c0_4 = arith.constant 0 : index
    %4 = vector.load %arg3[%c0_3, %c0_4] : memref<1x128xf32, #tpu.memory_space<vmem>>, vector<1x128xf32>
    %5 = vector.broadcast %4 : vector<1x128xf32> to vector<256x128xf32>
    %6 = arith.addf %3, %5 : vector<256x128xf32>
    %c0_5 = arith.constant 0 : index
    %c0_6 = arith.constant 0 : index
    %7 = vector.load %arg4[%c0_5, %c0_6] : memref<256x128xf32, #tpu.memory_space<vmem>>, vector<256x128xf32>
    %8 = arith.addf %6, %7 : vector<256x128xf32>
    %cst = arith.constant 0.000000e+00 : f32
    %9 = vector.broadcast %cst : f32 to vector<256x128xf32>
    %10 = arith.maximumf %8, %9 : vector<256x128xf32>
    %c0_7 = arith.constant 0 : index
    %c0_8 = arith.constant 0 : index
    %11 = vector.load %arg5[%c0_7, %c0_8] : memref<256x128xf32, #tpu.memory_space<vmem>>, vector<256x128xf32>
    tpu.vector_store %arg5[%c0_7, %c0_8], %10 {strides = array<i32>} : memref<256x128xf32, #tpu.memory_space<vmem>>, vector<256x128xf32>,
    return
  }
  func.func @transform_0(%arg0: i32) -> (i32, i32) {
    %c0_i32 = arith.constant 0 : i32
    %c0_i32_0 = arith.constant 0 : i32
    return %arg0, %c0_i32 : i32, i32
  }
  func.func @transform_1(%arg0: i32) -> (i32, i32) {
    %c0_i32 = arith.constant 0 : i32
    %c0_i32_0 = arith.constant 0 : i32
    %c0_i32_1 = arith.constant 0 : i32
    return %c0_i32, %c0_i32_0 : i32, i32
  }
  func.func @transform_2(%arg0: i32) -> (i32, i32) {
    %c0_i32 = arith.constant 0 : i32
    %c0_i32_0 = arith.constant 0 : i32
    %c0_i32_1 = arith.constant 0 : i32
    return %c0_i32, %c0_i32_0 : i32, i32
  }
  func.func @transform_3(%arg0: i32) -> (i32, i32) {
    %c0_i32 = arith.constant 0 : i32
    %c0_i32_0 = arith.constant 0 : i32
    return %arg0, %c0_i32 : i32, i32
  }
  func.func @transform_4(%arg0: i32) -> (i32, i32) {
    %c0_i32 = arith.constant 0 : i32
    %c0_i32_0 = arith.constant 0 : i32
    return %arg0, %c0_i32 : i32, i32
  }
}

</mosaic_0001>

<bundles_post_ra>
// kernel: residual_block_forward.7
= control target key start
LH: loop header
LB: loop body
LE: loop exit
PB: predicated region body
PF: predicated region fallthrough
CT: control target
= control target key end

     0   :  { %s447_s12 = smov 0   ;;  %s606_s0 = inlined_call_operand.vmem [shape: f32[512,128], index: 0, kind: input, shape index: {}]   ;;  %s607_s1 = inlined_call_operand.vmem [shape: f32[1,128], index: 1, kind: input, shape index: {}]   ;;  %s608_s2 = inlined_call_operand.vmem [shape: f32[1,128], index: 2, kind: input, shape index: {}]   ;;  %s609_s3 = inlined_call_operand.vmem [shape: f32[512,128], index: 3, kind: output, shape index: {}]  }
   0x1 LB: > { %s398_s13 = sadd.s32 4294967295, %s425_s12   ;;  %p402_p0 = scmp.ge.s32.totalorder %s425_s12, 1  ;;  %s425_s12 = sphi %s447_s12, %s13_s12  }
   0x2   : > { %p138_p1 = scmp.lt.s32.totalorder %s425_s12, 3 }
   0x4   : > { %p139_p2 = pnand %p402_p0, %p138_p1 }
   0x5   : > { %s403_s14 = sshll.u32 (!%p139_p2), %s398_s13, 5 }
   0x6   : > { %142 = sbr.rel (%p139_p2) target bundleno = 53 (0x35), region = 32  ;;  %p163_p3 = scmp.lt.s32.totalorder (!%p139_p2), %s403_s14, 63 }
   0xb   : > { %s611_s14 = smov (!%p163_p3, %s403_s14), 63  ;;  %v458_v0 = vld [vmem:[%s607_s1] ss:$0 sm:$0xff] }
   0xc   : > { %s404_s17 = sshll.u32 %s611_s14, 3  ;;  %v468_v1 = vld [vmem:[%s608_s2] ss:$0 sm:$0xff] }
   0xd   : > { %s463_s20 = scalar_lea.vmem %s606_s0, %s404_s17  ;;  %s491_s25 = scalar_lea.vmem %s609_s3, %s404_s17 }
   0xe   : > { %v174_v2 = vld [vmem:[%s463_s20] sm:$0xff]  ;;  %v175_v3 = vld [vmem:[%s463_s20 + $0x8] sm:$0xff]  ;;  %v176_v4 = vld [vmem:[%s463_s20 + $0x10] sm:$0xff] }
   0xf   : > { %v210_v5 = vmul.f32 %v458_v0, %v174_v2  ;;  %v211_v6 = vmul.f32 %v458_v0, %v175_v3  ;;  %v212_v7 = vmul.f32 %v458_v0, %v176_v4  ;;  %v177_v8 = vld [vmem:[%s463_s20 + $0x18] sm:$0xff]  ;;  %v178_v9 = vld [vmem:[%s463_s20 + $0x20] sm:$0xff]  ;;  %v179_v10 = vld [vmem:[%s463_s20 + $0x28] sm:$0xff] }
  0x10   : > { %v213_v11 = vmul.f32 %v458_v0, %v177_v8  ;;  %v214_v12 = vmul.f32 %v458_v0, %v178_v9  ;;  %v215_v13 = vmul.f32 %v458_v0, %v179_v10  ;;  %v180_v14 = vld [vmem:[%s463_s20 + $0x30] sm:$0xff]  ;;  %v181_v15 = vld [vmem:[%s463_s20 + $0x38] sm:$0xff]  ;;  %v182_v24 = vld [vmem:[%s463_s20 + $0x40] sm:$0xff] }
  0x11   : > { %v246_v16 = vadd.f32 %v468_v1, %v210_v5  ;;  %v247_v17 = vadd.f32 %v468_v1, %v211_v6  ;;  %v248_v18 = vadd.f32 %v468_v1, %v212_v7  ;;  %v216_v19 = vmul.f32 %v458_v0, %v180_v14  ;;  %v183_v25 = vld [vmem:[%s463_s20 + $0x48] sm:$0xff]  ;;  %v184_v26 = vld [vmem:[%s463_s20 + $0x50] sm:$0xff]  ;;  %v185_v31 = vld [vmem:[%s463_s20 + $0x58] sm:$0xff] }
  0x12   : > { %v249_v20 = vadd.f32 %v468_v1, %v213_v11  ;;  %v250_v21 = vadd.f32 %v468_v1, %v214_v12  ;;  %v251_v22 = vadd.f32 %v468_v1, %v215_v13  ;;  %v217_v23 = vmul.f32 %v458_v0, %v181_v15  ;;  %v186_v32 = vld [vmem:[%s463_s20 + $0x60] sm:$0xff]  ;;  %v187_v33 = vld [vmem:[%s463_s20 + $0x68] sm:$0xff]  ;;  %v188_v37 = vld [vmem:[%s463_s20 + $0x70] sm:$0xff] }
  0x13   : > { %v278_v27 = vmax.f32 %v246_v16, 0.0  ;;  %v279_v28 = vmax.f32 %v247_v17, 0.0  ;;  %v280_v29 = vmax.f32 %v248_v18, 0.0  ;;  %v252_v30 = vadd.f32 %v468_v1, %v216_v19  ;;  %v189_v42 = vld [vmem:[%s463_s20 + $0x78] sm:$0xff]  ;;  %v190_v54 = vld [vmem:[%s463_s20 + $0x80] sm:$0xff]  ;;  %v191_v55 = vld [vmem:[%s463_s20 + $0x88] sm:$0xff] }
  0x14   : > { %v281_v34 = vmax.f32 %v249_v20, 0.0  ;;  %v282_v35 = vmax.f32 %v250_v21, 0.0  ;;  %v253_v36 = vadd.f32 %v468_v1, %v217_v23  ;;  %v283_v38 = vmax.f32 %v251_v22, 0.0  ;;  %v192_v56 = vld [vmem:[%s463_s20 + $0x90] sm:$0xff]  ;;  %v193_v59 = vld [vmem:[%s463_s20 + $0x98] sm:$0xff]  ;;  %v194_v63 = vld [vmem:[%s463_s20 + $0xa0] sm:$0xff] }
  0x15   : > { %310 = vst [vmem:[%s491_s25] sm:$0xff] %v278_v27  ;;  %v218_v39 = vmul.f32 %v458_v0, %v182_v24  ;;  %v219_v40 = vmul.f32 %v458_v0, %v183_v25  ;;  %v220_v41 = vmul.f32 %v458_v0, %v184_v26  ;;  %v284_v43 = vmax.f32 %v252_v30, 0.0  ;;  %v195_v6 = vld [vmem:[%s463_s20 + $0xa8] sm:$0xff]  ;;  %v196_v10 = vld [vmem:[%s463_s20 + $0xb0] sm:$0xff]  ;;  %v197_v14 = vld [vmem:[%s463_s20 + $0xb8] sm:$0xff] }
  0x16   : > { %311 = vst [vmem:[%s491_s25 + $0x8] sm:$0xff] %v279_v28  ;;  %v221_v44 = vmul.f32 %v458_v0, %v185_v31  ;;  %v222_v45 = vmul.f32 %v458_v0, %v186_v32  ;;  %v223_v46 = vmul.f32 %v458_v0, %v187_v33  ;;  %v224_v50 = vmul.f32 %v458_v0, %v188_v37  ;;  %v198_v18 = vld [vmem:[%s463_s20 + $0xc0] sm:$0xff]  ;;  %v199_v22 = vld [vmem:[%s463_s20 + $0xc8] sm:$0xff]  ;;  %v200_v26 = vld [vmem:[%s463_s20 + $0xd0] sm:$0xff] }
  0x17   : > { %312 = vst [vmem:[%s491_s25 + $0x10] sm:$0xff] %v280_v29  ;;  %v254_v47 = vadd.f32 %v468_v1, %v218_v39  ;;  %v255_v48 = vadd.f32 %v468_v1, %v219_v40  ;;  %v256_v49 = vadd.f32 %v468_v1, %v220_v41  ;;  %v285_v51 = vmax.f32 %v253_v36, 0.0  ;;  %v201_v30 = vld [vmem:[%s463_s20 + $0xd8] sm:$0xff] }
  0x18   : > { %313 = vst [vmem:[%s491_s25 + $0x18] sm:$0xff] %v281_v34  ;;  %v257_v52 = vadd.f32 %v468_v1, %v221_v44  ;;  %v225_v53 = vmul.f32 %v458_v0, %v189_v42  ;;  %v258_v58 = vadd.f32 %v468_v1, %v222_v45  ;;  %v259_v62 = vadd.f32 %v468_v1, %v223_v46  ;;  %v202_v34 = vld [vmem:[%s463_s20 + $0xe0] sm:$0xff]  ;;  %v204_v42 = vld [vmem:[%s463_s20 + $0xf0] sm:$0xff]  ;;  %v205_v46 = vld [vmem:[%s463_s20 + $0xf8] sm:$0xff] }
  0x19   : > { %314 = vst [vmem:[%s491_s25 + $0x20] sm:$0xff] %v282_v35  ;;  %v286_v57 = vmax.f32 %v254_v47, 0.0  ;;  %v287_v60 = vmax.f32 %v255_v48, 0.0  ;;  %v288_v61 = vmax.f32 %v256_v49, 0.0  ;;  %v260_v2 = vadd.f32 %v468_v1, %v224_v50 }
  0x1a   : > { %315 = vst [vmem:[%s491_s25 + $0x28] sm:$0xff] %v283_v38  ;;  %v226_v3 = vmul.f32 %v458_v0, %v190_v54  ;;  %v227_v4 = vmul.f32 %v458_v0, %v191_v55  ;;  %v228_v5 = vmul.f32 %v458_v0, %v192_v56  ;;  %v289_v7 = vmax.f32 %v257_v52, 0.0  ;;  %v203_v38 = vld [vmem:[%s463_s20 + $0xe8] sm:$0xff] }
  0x1b   : > { %316 = vst [vmem:[%s491_s25 + $0x30] sm:$0xff] %v284_v43  ;;  %v261_v8 = vadd.f32 %v468_v1, %v225_v53  ;;  %v229_v9 = vmul.f32 %v458_v0, %v193_v59  ;;  %v290_v11 = vmax.f32 %v258_v58, 0.0  ;;  %v230_v13 = vmul.f32 %v458_v0, %v194_v63 }
  0x1c   : > { %317 = vst [vmem:[%s491_s25 + $0x38] sm:$0xff] %v285_v51  ;;  %v262_v12 = vadd.f32 %v468_v1, %v226_v3  ;;  %v291_v15 = vmax.f32 %v259_v62, 0.0  ;;  %v263_v16 = vadd.f32 %v468_v1, %v227_v4  ;;  %v231_v17 = vmul.f32 %v458_v0, %v195_v6 }
  0x1d   : > { %318 = vst [vmem:[%s491_s25 + $0x40] sm:$0xff] %v286_v57  ;;  %v292_v19 = vmax.f32 %v260_v2, 0.0  ;;  %v264_v20 = vadd.f32 %v468_v1, %v228_v5  ;;  %v232_v21 = vmul.f32 %v458_v0, %v196_v10  ;;  %v293_v23 = vmax.f32 %v261_v8, 0.0 }
  0x1e   : > { %319 = vst [vmem:[%s491_s25 + $0x48] sm:$0xff] %v287_v60  ;;  %v265_v24 = vadd.f32 %v468_v1, %v229_v9  ;;  %v233_v25 = vmul.f32 %v458_v0, %v197_v14  ;;  %v294_v27 = vmax.f32 %v262_v12, 0.0  ;;  %v266_v28 = vadd.f32 %v468_v1, %v230_v13 }
  0x1f   : > { %320 = vst [vmem:[%s491_s25 + $0x50] sm:$0xff] %v288_v61  ;;  %v234_v29 = vmul.f32 %v458_v0, %v198_v18  ;;  %v295_v31 = vmax.f32 %v263_v16, 0.0  ;;  %v267_v32 = vadd.f32 %v468_v1, %v231_v17  ;;  %v235_v33 = vmul.f32 %v458_v0, %v199_v22 }
  0x20   : > { %321 = vst [vmem:[%s491_s25 + $0x58] sm:$0xff] %v289_v7  ;;  %v296_v35 = vmax.f32 %v264_v20, 0.0  ;;  %v268_v36 = vadd.f32 %v468_v1, %v232_v21  ;;  %v236_v37 = vmul.f32 %v458_v0, %v200_v26  ;;  %v297_v39 = vmax.f32 %v265_v24, 0.0 }
  0x21   : > { %322 = vst [vmem:[%s491_s25 + $0x60] sm:$0xff] %v290_v11  ;;  %v269_v40 = vadd.f32 %v468_v1, %v233_v25  ;;  %v237_v41 = vmul.f32 %v458_v0, %v201_v30  ;;  %v298_v43 = vmax.f32 %v266_v28, 0.0  ;;  %v270_v44 = vadd.f32 %v468_v1, %v234_v29 }
  0x22   : > { %323 = vst [vmem:[%s491_s25 + $0x68] sm:$0xff] %v291_v15  ;;  %v238_v45 = vmul.f32 %v458_v0, %v202_v34  ;;  %v299_v47 = vmax.f32 %v267_v32, 0.0  ;;  %v271_v48 = vadd.f32 %v468_v1, %v235_v33  ;;  %v239_v49 = vmul.f32 %v458_v0, %v203_v38 }
  0x23   : > { %324 = vst [vmem:[%s491_s25 + $0x70] sm:$0xff] %v292_v19  ;;  %v300_v50 = vmax.f32 %v268_v36, 0.0  ;;  %v272_v51 = vadd.f32 %v468_v1, %v236_v37  ;;  %v240_v52 = vmul.f32 %v458_v0, %v204_v42  ;;  %v301_v53 = vmax.f32 %v269_v40, 0.0 }
  0x24   : > { %325 = vst [vmem:[%s491_s25 + $0x78] sm:$0xff] %v293_v23  ;;  %v273_v54 = vadd.f32 %v468_v1, %v237_v41  ;;  %v241_v55 = vmul.f32 %v458_v0, %v205_v46  ;;  %v302_v56 = vmax.f32 %v270_v44, 0.0  ;;  %v274_v57 = vadd.f32 %v468_v1, %v238_v45 }
  0x25   : > { %326 = vst [vmem:[%s491_s25 + $0x80] sm:$0xff] %v294_v27  ;;  %v303_v58 = vmax.f32 %v271_v48, 0.0  ;;  %v275_v59 = vadd.f32 %v468_v1, %v239_v49  ;;  %v304_v60 = vmax.f32 %v272_v51, 0.0  ;;  %v276_v61 = vadd.f32 %v468_v1, %v240_v52 }
  0x26   : > { %327 = vst [vmem:[%s491_s25 + $0x88] sm:$0xff] %v295_v31  ;;  %v305_v0 = vmax.f32 %v273_v54, 0.0  ;;  %v277_v62 = vadd.f32 %v468_v1, %v241_v55  ;;  %v306_v63 = vmax.f32 %v274_v57, 0.0 }
  0x27   : > { %328 = vst [vmem:[%s491_s25 + $0x90] sm:$0xff] %v296_v35  ;;  %v307_v2 = vmax.f32 %v275_v59, 0.0  ;;  %v308_v3 = vmax.f32 %v276_v61, 0.0 }
  0x28   : > { %329 = vst [vmem:[%s491_s25 + $0x98] sm:$0xff] %v297_v39  ;;  %v309_v4 = vmax.f32 %v277_v62, 0.0 }
  0x29   : > { %330 = vst [vmem:[%s491_s25 + $0xa0] sm:$0xff] %v298_v43 }
  0x2a   : > { %331 = vst [vmem:[%s491_s25 + $0xa8] sm:$0xff] %v299_v47 }
  0x2b   : > { %332 = vst [vmem:[%s491_s25 + $0xb0] sm:$0xff] %v300_v50 }
  0x2c   : > { %333 = vst [vmem:[%s491_s25 + $0xb8] sm:$0xff] %v301_v53 }
  0x2d   : > { %334 = vst [vmem:[%s491_s25 + $0xc0] sm:$0xff] %v302_v56 }
  0x2e   : > { %335 = vst [vmem:[%s491_s25 + $0xc8] sm:$0xff] %v303_v58 }
  0x2f   : > { %336 = vst [vmem:[%s491_s25 + $0xd0] sm:$0xff] %v304_v60 }
  0x30   : > { %337 = vst [vmem:[%s491_s25 + $0xd8] sm:$0xff] %v305_v0 }
  0x31   : > { %338 = vst [vmem:[%s491_s25 + $0xe0] sm:$0xff] %v306_v63 }
  0x32   : > { %339 = vst [vmem:[%s491_s25 + $0xe8] sm:$0xff] %v307_v2 }
  0x33   : > { %340 = vst [vmem:[%s491_s25 + $0xf0] sm:$0xff] %v308_v3 }
  0x34   : > { %341 = vst [vmem:[%s491_s25 + $0xf8] sm:$0xff] %v309_v4 }
  0x35 PF: > { %s13_s12 = sadd.s32 1, %s425_s12  }
  0x36   : > { %p10_p4 = scmp.ge.s32.totalorder %s13_s12, 4  }
  0x38   :  { %12 = sbr.rel (!%p10_p4) target bundleno = 1 (0x1), region = 62 }

// kernel: residual_block_forward.6
= control target key start
LH: loop header
LB: loop body
LE: loop exit
PB: predicated region body
PF: predicated region fallthrough
CT: control target
= control target key end

     0   :  { %s888_s12 = smov 0   ;;  %s1107_s0 = inlined_call_operand.vmem [shape: bf16[512,128], index: 0, kind: input, shape index: {}]   ;;  %s1108_s1 = inlined_call_operand.vmem [shape: bf16[128,128], index: 1, kind: input, shape index: {}]   ;;  %s1109_s2 = inlined_call_operand.vmem [shape: f32[512,128], index: 2, kind: output, shape index: {0}]   ;;  %s1110_s3 = inlined_call_operand.vmem [shape: f32[2,8,128], index: 3, kind: output, shape index: {1}]  }
   0x1 LB: > { %s894_s13 = sadd.s32 4294967295, %s866_s12   ;;  %p700_p0 = scmp.ge.s32.totalorder %s866_s12, 1  ;;  %s866_s12 = sphi %s888_s12, %s14_s12  }
   0x2   : > { %p141_p1 = scmp.lt.s32.totalorder %s866_s12, 3 }
   0x4   : > { %p142_p2 = pnand %p700_p0, %p141_p1 }
   0x5   : > { %s701_s22 = sshll.u32 (!%p142_p2), %s894_s13, 5  ;;  %p181_p4 = scmp.lt.s32.totalorder (!%p142_p2), %s894_s13, 1 }
   0x6   : > { %145 = sbr.rel (%p142_p2) target bundleno = 292 (0x124), region = 28  ;;  %p170_p3 = scmp.lt.s32.totalorder (!%p142_p2), %s701_s22, 63 }
   0xb   : > { %v827_v0 = vld [vmem:[%s1108_s1 + $0x38] sm:$0xff]  ;;  %v826_v1 = vld [vmem:[%s1108_s1 + $0x30] sm:$0xff]  ;;  %v825_v2 = vld [vmem:[%s1108_s1 + $0x28] sm:$0xff]  ;;  %s1112_s22 = smov (!%p170_p3, %s701_s22), 63  ;;  %s1114_s13 = smov (!%p181_p4, %s894_s13), 1  ;;  %vm604_vm0 = vcmask 1040384  }
   0xc   : > { %377 = vmatpush.bf16.msra.mxu0 %v827_v0  ;;  %828 = vmatpush.bf16.msra.mxu1 %v827_v0  ;;  %v824_v3 = vld [vmem:[%s1108_s1 + $0x20] sm:$0xff]  ;;  %v823_v4 = vld [vmem:[%s1108_s1 + $0x18] sm:$0xff]  ;;  %v822_v5 = vld [vmem:[%s1108_s1 + $0x10] sm:$0xff]  ;;  %s702_s29 = sshll.u32 %s1112_s22, 2  ;;  %s704_s8 = sshll.u32 %s1112_s22, 3  ;;  %vm606_vm1 = vcmask 1041408  }
   0xd   : > { %829 = vmatpush.bf16.msra.mxu2 %v827_v0  ;;  %830 = vmatpush.bf16.msra.mxu3 %v827_v0  ;;  %v821_v6 = vld [vmem:[%s1108_s1 + $0x8] sm:$0xff]  ;;  %v820_v7 = vld [vmem:[%s1108_s1] sm:$0xff]  ;;  %s929_s7 = scalar_lea.vmem %s1107_s0, %s702_s29  ;;  %s951_s11 = scalar_lea.vmem %s1109_s2, %s704_s8 }
   0xe   : > { %v804_v8 = vld [vmem:[%s929_s7] sm:$0xff]  ;;  %v805_v12 = vld [vmem:[%s929_s7 + $0x8] sm:$0xff]  ;;  %v806_v16 = vld [vmem:[%s929_s7 + $0x10] sm:$0xff]  ;;  %s705_s14 = sshll.u32 %s1114_s13, 3 }
   0xf   : > { %v808_v9 = vld [vmem:[%s929_s7 + $0x20] sm:$0xff]  ;;  %v809_v13 = vld [vmem:[%s929_s7 + $0x28] sm:$0xff]  ;;  %v810_v17 = vld [vmem:[%s929_s7 + $0x30] sm:$0xff]  ;;  %s184_s17 = scalar_lea.vmem %s1110_s3, %s705_s14 }
  0x10   : > { %378 = vmatpush.bf16.msra.mxu0 %v826_v1  ;;  %831 = vmatpush.bf16.msra.mxu1 %v826_v1  ;;  %v812_v10 = vld [vmem:[%s929_s7 + $0x40] sm:$0xff]  ;;  %v813_v14 = vld [vmem:[%s929_s7 + $0x48] sm:$0xff]  ;;  %v814_v18 = vld [vmem:[%s929_s7 + $0x50] sm:$0xff] }
  0x11   : > { %832 = vmatpush.bf16.msra.mxu2 %v826_v1  ;;  %833 = vmatpush.bf16.msra.mxu3 %v826_v1  ;;  %v816_v11 = vld [vmem:[%s929_s7 + $0x60] sm:$0xff]  ;;  %v817_v15 = vld [vmem:[%s929_s7 + $0x68] sm:$0xff]  ;;  %v818_v19 = vld [vmem:[%s929_s7 + $0x70] sm:$0xff] }
  0x12   : > { %v807_v20 = vld [vmem:[%s929_s7 + $0x18] sm:$0xff] }
  0x13   : > { %v811_v21 = vld [vmem:[%s929_s7 + $0x38] sm:$0xff] }
  0x14   : > { %379 = vmatpush.bf16.msra.mxu0 %v825_v2  ;;  %834 = vmatpush.bf16.msra.mxu1 %v825_v2  ;;  %v815_v22 = vld [vmem:[%s929_s7 + $0x58] sm:$0xff] }
  0x15   : > { %835 = vmatpush.bf16.msra.mxu2 %v825_v2  ;;  %836 = vmatpush.bf16.msra.mxu3 %v825_v2  ;;  %v819_v23 = vld [vmem:[%s929_s7 + $0x78] sm:$0xff] }
  0x18   : > { %380 = vmatpush.bf16.msra.mxu0 %v824_v3  ;;  %837 = vmatpush.bf16.msra.mxu1 %v824_v3 }
  0x19   : > { %838 = vmatpush.bf16.msra.mxu2 %v824_v3  ;;  %839 = vmatpush.bf16.msra.mxu3 %v824_v3 }
  0x1c   : > { %381 = vmatpush.bf16.msra.mxu0 %v823_v4  ;;  %840 = vmatpush.bf16.msra.mxu1 %v823_v4 }
  0x1d   : > { %841 = vmatpush.bf16.msra.mxu2 %v823_v4  ;;  %842 = vmatpush.bf16.msra.mxu3 %v823_v4 }
  0x20   : > { %382 = vmatpush.bf16.msra.mxu0 %v822_v5  ;;  %843 = vmatpush.bf16.msra.mxu1 %v822_v5 }
  0x21   : > { %844 = vmatpush.bf16.msra.mxu2 %v822_v5  ;;  %845 = vmatpush.bf16.msra.mxu3 %v822_v5 }
  0x24   : > { %383 = vmatpush.bf16.msra.mxu0 %v821_v6  ;;  %846 = vmatpush.bf16.msra.mxu1 %v821_v6 }
  0x25   : > { %847 = vmatpush.bf16.msra.mxu2 %v821_v6  ;;  %848 = vmatpush.bf16.msra.mxu3 %v821_v6 }
  0x28   : > { %384 = vmatpush.bf16.msra.mxu0 %v820_v7  ;;  %849 = vmatpush.bf16.msra.mxu1 %v820_v7 }
  0x29   : > { %850 = vmatpush.bf16.msra.mxu2 %v820_v7  ;;  %851 = vmatpush.bf16.msra.mxu3 %v820_v7 }
  0x2b   : > { %385 = vmatmul.bf16.vlgmr.msra.gmra.mxu0 %v804_v8  ;;  %405 = vmatmul.bf16.vlgmr.msra.gmra.mxu1 %v808_v9 }
  0x2c   : > { %425 = vmatmul.bf16.vlgmr.msra.gmra.mxu2 %v812_v10  ;;  %445 = vmatmul.bf16.vlgmr.msra.gmra.mxu3 %v816_v11 }
  0x3b   : > { %390 = vmatmul.bf16.gmra.mxu0 %v805_v12  ;;  %410 = vmatmul.bf16.gmra.mxu1 %v809_v13 }
  0x3c   : > { %430 = vmatmul.bf16.gmra.mxu2 %v813_v14  ;;  %450 = vmatmul.bf16.gmra.mxu3 %v817_v15 }
  0x4b   : > { %395 = vmatmul.bf16.gmra.mxu0 %v806_v16  ;;  %415 = vmatmul.bf16.gmra.mxu1 %v810_v17 }
  0x4c   : > { %435 = vmatmul.bf16.gmra.mxu2 %v814_v18  ;;  %455 = vmatmul.bf16.gmra.mxu3 %v818_v19 }
  0x5b   : > { %400 = vmatmul.bf16.gmra.mxu0 %v807_v20  ;;  %420 = vmatmul.bf16.gmra.mxu1 %v811_v21 }
  0x5c   : > { %440 = vmatmul.bf16.gmra.mxu2 %v815_v22  ;;  %460 = vmatmul.bf16.gmra.mxu3 %v819_v23 }
  0xa8   : > { %v386_v24 = vpop.f32.mrf.mxu0  ;;  %v953_v25 = vpop.f32.mrf.mxu1 }
  0xa9   : > { %466 = vst [vmem:[%s951_s11] sm:$0xff] %v386_v24  ;;  %v535_v47 = vmul.f32 %v386_v24, %v386_v24  ;;  %v543_v11 = vmul.f32 %v953_v25, %v953_v25 }
  0xaa   : > { %474 = vst [vmem:[%s951_s11 + $0x40] sm:$0xff] %v953_v25 }
  0xaf   : > { %v958_v26 = vpop.f32.mrf.mxu2  ;;  %v965_v29 = vpop.f32.mrf.mxu3 }
  0xb0   : > { %v388_v27 = vpop.f32.mrf.mxu0  ;;  %v960_v28 = vpop.f32.mrf.mxu1  ;;  %482 = vst [vmem:[%s951_s11 + $0x80] sm:$0xff] %v958_v26 }
  0xb1   : > { %467 = vst [vmem:[%s951_s11 + $0x8] sm:$0xff] %v388_v27  ;;  %v536_v46 = vmul.f32 %v388_v27, %v388_v27  ;;  %v498_v48 = vadd.f32 %v388_v27, %v386_v24  ;;  %v544_v14 = vmul.f32 %v960_v28, %v960_v28 }
  0xb2   : > { %475 = vst [vmem:[%s951_s11 + $0x48] sm:$0xff] %v960_v28 }
  0xb3   : > { %490 = vst [vmem:[%s951_s11 + $0xc0] sm:$0xff] %v965_v29  ;;  %v567_v50 = vadd.f32 %v536_v46, %v535_v47 }
  0xb7   : > { %v971_v30 = vpop.f32.mrf.mxu2  ;;  %v978_v33 = vpop.f32.mrf.mxu3 }
  0xb8   : > { %v391_v31 = vpop.f32.mrf.mxu0  ;;  %v973_v32 = vpop.f32.mrf.mxu1  ;;  %483 = vst [vmem:[%s951_s11 + $0x88] sm:$0xff] %v971_v30 }
  0xb9   : > { %468 = vst [vmem:[%s951_s11 + $0x10] sm:$0xff] %v391_v31  ;;  %v537_v49 = vmul.f32 %v391_v31, %v391_v31  ;;  %v499_v51 = vadd.f32 %v498_v48, %v391_v31  ;;  %v545_v17 = vmul.f32 %v973_v32, %v973_v32 }
  0xba   : > { %476 = vst [vmem:[%s951_s11 + $0x50] sm:$0xff] %v973_v32 }
  0xbb   : > { %491 = vst [vmem:[%s951_s11 + $0xc8] sm:$0xff] %v978_v33  ;;  %v568_v56 = vadd.f32 %v567_v50, %v537_v49  ;;  %v551_v49 = vmul.f32 %v958_v26, %v958_v26 }
  0xbf   : > { %v984_v34 = vpop.f32.mrf.mxu2  ;;  %v991_v37 = vpop.f32.mrf.mxu3 }
  0xc0   : > { %v393_v35 = vpop.f32.mrf.mxu0  ;;  %v986_v36 = vpop.f32.mrf.mxu1  ;;  %484 = vst [vmem:[%s951_s11 + $0x90] sm:$0xff] %v984_v34 }
  0xc1   : > { %469 = vst [vmem:[%s951_s11 + $0x18] sm:$0xff] %v393_v35  ;;  %v538_v52 = vmul.f32 %v393_v35, %v393_v35  ;;  %v500_v57 = vadd.f32 %v499_v51, %v393_v35  ;;  %v546_v21 = vmul.f32 %v986_v36, %v986_v36 }
  0xc2   : > { %477 = vst [vmem:[%s951_s11 + $0x58] sm:$0xff] %v986_v36 }
  0xc3   : > { %492 = vst [vmem:[%s951_s11 + $0xd0] sm:$0xff] %v991_v37  ;;  %v569_v60 = vadd.f32 %v568_v56, %v538_v52 }
  0xc7   : > { %v997_v38 = vpop.f32.mrf.mxu2  ;;  %v1004_v41 = vpop.f32.mrf.mxu3 }
  0xc8   : > { %v396_v39 = vpop.f32.mrf.mxu0  ;;  %v999_v40 = vpop.f32.mrf.mxu1  ;;  %485 = vst [vmem:[%s951_s11 + $0x98] sm:$0xff] %v997_v38 }
  0xc9   : > { %470 = vst [vmem:[%s951_s11 + $0x20] sm:$0xff] %v396_v39  ;;  %v539_v58 = vmul.f32 %v396_v39, %v396_v39  ;;  %v501_v61 = vadd.f32 %v500_v57, %v396_v39  ;;  %v554_v57 = vmul.f32 %v997_v38, %v997_v38 }
  0xca   : > { %478 = vst [vmem:[%s951_s11 + $0x60] sm:$0xff] %v999_v40 }
  0xcb   : > { %493 = vst [vmem:[%s951_s11 + $0xd8] sm:$0xff] %v1004_v41  ;;  %v570_v63 = vadd.f32 %v569_v60, %v539_v58 }
  0xcf   : > { %v1010_v42 = vpop.f32.mrf.mxu2  ;;  %v1017_v45 = vpop.f32.mrf.mxu3 }
  0xd0   : > { %v398_v43 = vpop.f32.mrf.mxu0  ;;  %v1012_v44 = vpop.f32.mrf.mxu1  ;;  %486 = vst [vmem:[%s951_s11 + $0xa0] sm:$0xff] %v1010_v42 }
  0xd1   : > { %471 = vst [vmem:[%s951_s11 + $0x28] sm:$0xff] %v398_v43  ;;  %v540_v62 = vmul.f32 %v398_v43, %v398_v43  ;;  %v502_v0 = vadd.f32 %v501_v61, %v398_v43  ;;  %v548_v31 = vmul.f32 %v1012_v44, %v1012_v44 }
  0xd2   : > { %479 = vst [vmem:[%s951_s11 + $0x68] sm:$0xff] %v1012_v44 }
  0xd3   : > { %494 = vst [vmem:[%s951_s11 + $0xe0] sm:$0xff] %v1017_v45  ;;  %v571_v2 = vadd.f32 %v570_v63, %v540_v62 }
  0xd7   : > { %v1023_v53 = vpop.f32.mrf.mxu2  ;;  %v1028_v59 = vpop.f32.mrf.mxu3 }
  0xd8   : > { %v401_v54 = vpop.f32.mrf.mxu0  ;;  %v421_v55 = vpop.f32.mrf.mxu1  ;;  %487 = vst [vmem:[%s951_s11 + $0xa8] sm:$0xff] %v1023_v53  ;;  %v556_v63 = vmul.f32 %v1023_v53, %v1023_v53 }
  0xd9   : > { %472 = vst [vmem:[%s951_s11 + $0x30] sm:$0xff] %v401_v54  ;;  %v541_v1 = vmul.f32 %v401_v54, %v401_v54  ;;  %v503_v3 = vadd.f32 %v502_v0, %v401_v54  ;;  %v549_v43 = vmul.f32 %v421_v55, %v421_v55 }
  0xda   : > { %480 = vst [vmem:[%s951_s11 + $0x70] sm:$0xff] %v421_v55 }
  0xdb   : > { %495 = vst [vmem:[%s951_s11 + $0xe8] sm:$0xff] %v1028_v59  ;;  %v572_v7 = vadd.f32 %v571_v2, %v541_v1 }
  0xdf   : > { %v441_v4 = vpop.f32.mrf.mxu2  ;;  %v1035_v10 = vpop.f32.mrf.mxu3 }
  0xe0   : > { %v403_v5 = vpop.f32.mrf.mxu0  ;;  %v423_v6 = vpop.f32.mrf.mxu1  ;;  %488 = vst [vmem:[%s951_s11 + $0xb0] sm:$0xff] %v441_v4  ;;  %v557_v2 = vmul.f32 %v441_v4, %v441_v4 }
  0xe1   : > { %473 = vst [vmem:[%s951_s11 + $0x38] sm:$0xff] %v403_v5  ;;  %v504_v8 = vadd.f32 %v503_v3, %v403_v5  ;;  %v542_v9 = vmul.f32 %v403_v5, %v403_v5 }
  0xe2   : > { %481 = vst [vmem:[%s951_s11 + $0x78] sm:$0xff] %v423_v6 }
  0xe3   : > { %v505_v12 = vadd.f32 %v504_v8, %v953_v25  ;;  %v573_v13 = vadd.f32 %v572_v7, %v542_v9  ;;  %496 = vst [vmem:[%s951_s11 + $0xf0] sm:$0xff] %v1035_v10  ;;  %v547_v25 = vmul.f32 %v999_v40, %v999_v40 }
  0xe5   : > { %v506_v15 = vadd.f32 %v505_v12, %v960_v28  ;;  %v574_v16 = vadd.f32 %v573_v13, %v543_v11  ;;  %v562_v13 = vmul.f32 %v1004_v41, %v1004_v41 }
  0xe7   : > { %v507_v18 = vadd.f32 %v506_v15, %v973_v32  ;;  %v575_v19 = vadd.f32 %v574_v16, %v544_v14  ;;  %v443_v20 = vpop.f32.mrf.mxu2  ;;  %v463_v24 = vpop.f32.mrf.mxu3  ;;  %v563_v15 = vmul.f32 %v1017_v45, %v1017_v45 }
  0xe8   : > { %489 = vst [vmem:[%s951_s11 + $0xb8] sm:$0xff] %v443_v20 }
  0xe9   : > { %v576_v22 = vadd.f32 %v575_v19, %v545_v17  ;;  %v508_v23 = vadd.f32 %v507_v18, %v986_v36  ;;  %497 = vst [vmem:[%s951_s11 + $0xf8] sm:$0xff] %v463_v24  ;;  %v550_v36 = vmul.f32 %v423_v6, %v423_v6 }
  0xeb   : > { %v509_v27 = vadd.f32 %v508_v23, %v999_v40  ;;  %v577_v28 = vadd.f32 %v576_v22, %v546_v21  ;;  %v552_v40 = vmul.f32 %v971_v30, %v971_v30  ;;  %v565_v21 = vmul.f32 %v1035_v10, %v1035_v10 }
  0xec   : > { %v566_v23 = vmul.f32 %v463_v24, %v463_v24 }
  0xed   : > { %v510_v32 = vadd.f32 %v509_v27, %v1012_v44  ;;  %v578_v35 = vadd.f32 %v577_v28, %v547_v25  ;;  %v553_v44 = vmul.f32 %v984_v34, %v984_v34 }
  0xef   : > { %v511_v39 = vadd.f32 %v510_v32, %v421_v55  ;;  %v579_v46 = vadd.f32 %v578_v35, %v548_v31 }
  0xf1   : > { %v580_v47 = vadd.f32 %v579_v46, %v549_v43  ;;  %v512_v48 = vadd.f32 %v511_v39, %v423_v6  ;;  %v558_v6 = vmul.f32 %v443_v20, %v443_v20 }
  0xf3   : > { %v513_v50 = vadd.f32 %v512_v48, %v958_v26  ;;  %v581_v51 = vadd.f32 %v580_v47, %v550_v36  ;;  %v555_v26 = vmul.f32 %v1010_v42, %v1010_v42 }
  0xf5   : > { %v514_v52 = vadd.f32 %v513_v50, %v971_v30  ;;  %v582_v54 = vadd.f32 %v581_v51, %v551_v49 }
  0xf7   : > { %v515_v55 = vadd.f32 %v514_v52, %v984_v34  ;;  %v583_v56 = vadd.f32 %v582_v54, %v552_v40 }
  0xf9   : > { %v584_v58 = vadd.f32 %v583_v56, %v553_v44  ;;  %v516_v60 = vadd.f32 %v515_v55, %v997_v38  ;;  %v559_v38 = vmul.f32 %v965_v29, %v965_v29 }
  0xfb   : > { %v517_v61 = vadd.f32 %v516_v60, %v1010_v42  ;;  %v585_v62 = vadd.f32 %v584_v58, %v554_v57  ;;  %v560_v42 = vmul.f32 %v978_v33, %v978_v33 }
  0xfd   : > { %v518_v30 = vadd.f32 %v517_v61, %v1023_v53  ;;  %v586_v0 = vadd.f32 %v585_v62, %v555_v26  ;;  %v561_v53 = vmul.f32 %v991_v37, %v991_v37 }
  0xff   : > { %v587_v34 = vadd.f32 %v586_v0, %v556_v63  ;;  %v519_v1 = vadd.f32 %v518_v30, %v441_v4 }
 0x101   : > { %v588_v3 = vadd.f32 %v587_v34, %v557_v2  ;;  %v520_v5 = vadd.f32 %v519_v1, %v443_v20 }
 0x103   : > { %v521_v7 = vadd.f32 %v520_v5, %v965_v29  ;;  %v589_v8 = vadd.f32 %v588_v3, %v558_v6 }
 0x105   : > { %v522_v9 = vadd.f32 %v521_v7, %v978_v33  ;;  %v590_v11 = vadd.f32 %v589_v8, %v559_v38 }
 0x107   : > { %v523_v4 = vadd.f32 %v522_v9, %v991_v37  ;;  %v591_v12 = vadd.f32 %v590_v11, %v560_v42  ;;  %v564_v37 = vmul.f32 %v1028_v59, %v1028_v59 }
 0x109   : > { %v592_v14 = vadd.f32 %v591_v12, %v561_v53  ;;  %v524_v29 = vadd.f32 %v523_v4, %v1004_v41 }
 0x10b   : > { %v525_v16 = vadd.f32 %v524_v29, %v1017_v45  ;;  %v593_v33 = vadd.f32 %v592_v14, %v562_v13 }
 0x10d   : > { %v526_v17 = vadd.f32 %v525_v16, %v1028_v59  ;;  %v594_v18 = vadd.f32 %v593_v33, %v563_v15 }
 0x10f   : > { %v595_v19 = vadd.f32 %v594_v18, %v564_v37  ;;  %v527_v20 = vadd.f32 %v526_v17, %v1035_v10 }
 0x111   : > { %v596_v41 = vadd.f32 %v595_v19, %v565_v21  ;;  %v528_v22 = vadd.f32 %v527_v20, %v463_v24 }
 0x113   : > { %v529_v25 = vrot.slane %v528_v22, 4  ;;  %v597_v27 = vadd.f32 %v596_v41, %v566_v23 }
 0x115   : > { %v530_v45 = vadd.f32 %v529_v25, %v528_v22  ;;  %v598_v28 = vrot.slane %v597_v27, 4 }
 0x117   : > { %v531_v31 = vrot.slane %v530_v45, 2  ;;  %v599_v32 = vadd.f32 %v598_v28, %v597_v27 }
 0x119   : > { %v532_v35 = vadd.f32 %v531_v31, %v530_v45  ;;  %v600_v59 = vrot.slane %v599_v32, 2 }
 0x11b   : > { %v533_v39 = vrot.slane %v532_v35, 1  ;;  %v601_v43 = vadd.f32 %v600_v59, %v599_v32 }
 0x11d   : > { %v602_v46 = vrot.slane %v601_v43, 1  ;;  %v534_v47 = vadd.f32 %v533_v39, %v532_v35 }
 0x11f   : > { %v603_v10 = vadd.f32 %v602_v46, %v601_v43 }
 0x121   : > { %v605_v24 = vsel %vm604_vm0, %v534_v47, %v603_v10 }
 0x122   : > { %v607_v48 = vsel %vm606_vm1, %v605_v24, 0.0 }
 0x123   : > { %608 = vst [vmem:[%s184_s17] sm:$0xff] %v607_v48 }
 0x124 PF: > { %s14_s12 = sadd.s32 1, %s866_s12  }
 0x125   : > { %p11_p5 = scmp.ge.s32.totalorder %s14_s12, 4  }
 0x127   :  { %13 = sbr.rel (!%p11_p5) target bundleno = 1 (0x1), region = 70 }

// kernel: residual_block_forward.9
= control target key start
LH: loop header
LB: loop body
LE: loop exit
PB: predicated region body
PF: predicated region fallthrough
CT: control target
= control target key end

     0   :  { %s415_s12 = smov 0   ;;  %s574_s0 = inlined_call_operand.vmem [shape: f32[512,128], index: 0, kind: input, shape index: {}]   ;;  %s575_s1 = inlined_call_operand.vmem [shape: f32[1,128], index: 1, kind: input, shape index: {}]   ;;  %s576_s2 = inlined_call_operand.vmem [shape: f32[1,128], index: 2, kind: input, shape index: {}]   ;;  %s577_s3 = inlined_call_operand.vmem [shape: f32[512,128], index: 3, kind: output, shape index: {}]  }
   0x1 LB: > { %s366_s13 = sadd.s32 4294967295, %s393_s12   ;;  %p370_p0 = scmp.ge.s32.totalorder %s393_s12, 1  ;;  %s393_s12 = sphi %s415_s12, %s13_s12  }
   0x2   : > { %p138_p1 = scmp.lt.s32.totalorder %s393_s12, 3 }
   0x4   : > { %p139_p2 = pnand %p370_p0, %p138_p1 }
   0x5   : > { %s371_s14 = sshll.u32 (!%p139_p2), %s366_s13, 5 }
   0x6   : > { %142 = sbr.rel (%p139_p2) target bundleno = 51 (0x33), region = 32  ;;  %p163_p3 = scmp.lt.s32.totalorder (!%p139_p2), %s371_s14, 63 }
   0xb   : > { %s579_s14 = smov (!%p163_p3, %s371_s14), 63  ;;  %v426_v0 = vld [vmem:[%s575_s1] ss:$0 sm:$0xff] }
   0xc   : > { %s372_s17 = sshll.u32 %s579_s14, 3  ;;  %v436_v1 = vld [vmem:[%s576_s2] ss:$0 sm:$0xff] }
   0xd   : > { %s431_s20 = scalar_lea.vmem %s574_s0, %s372_s17  ;;  %s450_s25 = scalar_lea.vmem %s577_s3, %s372_s17 }
   0xe   : > { %v174_v2 = vld [vmem:[%s431_s20] sm:$0xff]  ;;  %v175_v3 = vld [vmem:[%s431_s20 + $0x8] sm:$0xff]  ;;  %v176_v4 = vld [vmem:[%s431_s20 + $0x10] sm:$0xff] }
   0xf   : > { %v210_v5 = vmul.f32 %v426_v0, %v174_v2  ;;  %v211_v6 = vmul.f32 %v426_v0, %v175_v3  ;;  %v212_v7 = vmul.f32 %v426_v0, %v176_v4  ;;  %v177_v8 = vld [vmem:[%s431_s20 + $0x18] sm:$0xff]  ;;  %v178_v9 = vld [vmem:[%s431_s20 + $0x20] sm:$0xff]  ;;  %v179_v10 = vld [vmem:[%s431_s20 + $0x28] sm:$0xff] }
  0x10   : > { %v213_v11 = vmul.f32 %v426_v0, %v177_v8  ;;  %v214_v12 = vmul.f32 %v426_v0, %v178_v9  ;;  %v215_v13 = vmul.f32 %v426_v0, %v179_v10  ;;  %v180_v14 = vld [vmem:[%s431_s20 + $0x30] sm:$0xff]  ;;  %v181_v15 = vld [vmem:[%s431_s20 + $0x38] sm:$0xff]  ;;  %v182_v16 = vld [vmem:[%s431_s20 + $0x40] sm:$0xff] }
  0x11   : > { %v246_v17 = vadd.f32 %v436_v1, %v210_v5  ;;  %v247_v18 = vadd.f32 %v436_v1, %v211_v6  ;;  %v248_v19 = vadd.f32 %v436_v1, %v212_v7  ;;  %v216_v20 = vmul.f32 %v426_v0, %v180_v14  ;;  %v183_v21 = vld [vmem:[%s431_s20 + $0x48] sm:$0xff]  ;;  %v184_v24 = vld [vmem:[%s431_s20 + $0x50] sm:$0xff]  ;;  %v185_v27 = vld [vmem:[%s431_s20 + $0x58] sm:$0xff] }
  0x12   : > { %v249_v22 = vadd.f32 %v436_v1, %v213_v11  ;;  %v217_v23 = vmul.f32 %v426_v0, %v181_v15  ;;  %v250_v25 = vadd.f32 %v436_v1, %v214_v12  ;;  %v218_v26 = vmul.f32 %v426_v0, %v182_v16  ;;  %v186_v30 = vld [vmem:[%s431_s20 + $0x60] sm:$0xff]  ;;  %v187_v33 = vld [vmem:[%s431_s20 + $0x68] sm:$0xff]  ;;  %v188_v36 = vld [vmem:[%s431_s20 + $0x70] sm:$0xff] }
  0x13   : > { %278 = vst [vmem:[%s450_s25] sm:$0xff] %v246_v17  ;;  %v251_v28 = vadd.f32 %v436_v1, %v215_v13  ;;  %v219_v29 = vmul.f32 %v426_v0, %v183_v21  ;;  %v252_v31 = vadd.f32 %v436_v1, %v216_v20  ;;  %v220_v32 = vmul.f32 %v426_v0, %v184_v24  ;;  %v189_v39 = vld [vmem:[%s431_s20 + $0x78] sm:$0xff]  ;;  %v190_v42 = vld [vmem:[%s431_s20 + $0x80] sm:$0xff]  ;;  %v191_v45 = vld [vmem:[%s431_s20 + $0x88] sm:$0xff] }
  0x14   : > { %279 = vst [vmem:[%s450_s25 + $0x8] sm:$0xff] %v247_v18  ;;  %v253_v34 = vadd.f32 %v436_v1, %v217_v23  ;;  %v221_v35 = vmul.f32 %v426_v0, %v185_v27  ;;  %v254_v37 = vadd.f32 %v436_v1, %v218_v26  ;;  %v222_v38 = vmul.f32 %v426_v0, %v186_v30  ;;  %v192_v48 = vld [vmem:[%s431_s20 + $0x90] sm:$0xff]  ;;  %v193_v51 = vld [vmem:[%s431_s20 + $0x98] sm:$0xff]  ;;  %v194_v54 = vld [vmem:[%s431_s20 + $0xa0] sm:$0xff] }
  0x15   : > { %280 = vst [vmem:[%s450_s25 + $0x10] sm:$0xff] %v248_v19  ;;  %v255_v40 = vadd.f32 %v436_v1, %v219_v29  ;;  %v223_v41 = vmul.f32 %v426_v0, %v187_v33  ;;  %v256_v43 = vadd.f32 %v436_v1, %v220_v32  ;;  %v224_v44 = vmul.f32 %v426_v0, %v188_v36  ;;  %v195_v57 = vld [vmem:[%s431_s20 + $0xa8] sm:$0xff]  ;;  %v196_v60 = vld [vmem:[%s431_s20 + $0xb0] sm:$0xff]  ;;  %v197_v63 = vld [vmem:[%s431_s20 + $0xb8] sm:$0xff] }
  0x16   : > { %281 = vst [vmem:[%s450_s25 + $0x18] sm:$0xff] %v249_v22  ;;  %v257_v46 = vadd.f32 %v436_v1, %v221_v35  ;;  %v225_v47 = vmul.f32 %v426_v0, %v189_v39  ;;  %v258_v49 = vadd.f32 %v436_v1, %v222_v38  ;;  %v226_v50 = vmul.f32 %v426_v0, %v190_v42  ;;  %v198_v4 = vld [vmem:[%s431_s20 + $0xc0] sm:$0xff]  ;;  %v199_v7 = vld [vmem:[%s431_s20 + $0xc8] sm:$0xff]  ;;  %v200_v10 = vld [vmem:[%s431_s20 + $0xd0] sm:$0xff] }
  0x17   : > { %282 = vst [vmem:[%s450_s25 + $0x20] sm:$0xff] %v250_v25  ;;  %v259_v52 = vadd.f32 %v436_v1, %v223_v41  ;;  %v227_v53 = vmul.f32 %v426_v0, %v191_v45  ;;  %v260_v55 = vadd.f32 %v436_v1, %v224_v44  ;;  %v228_v56 = vmul.f32 %v426_v0, %v192_v48  ;;  %v201_v13 = vld [vmem:[%s431_s20 + $0xd8] sm:$0xff]  ;;  %v202_v16 = vld [vmem:[%s431_s20 + $0xe0] sm:$0xff]  ;;  %v203_v19 = vld [vmem:[%s431_s20 + $0xe8] sm:$0xff] }
  0x18   : > { %283 = vst [vmem:[%s450_s25 + $0x28] sm:$0xff] %v251_v28  ;;  %v261_v58 = vadd.f32 %v436_v1, %v225_v47  ;;  %v229_v59 = vmul.f32 %v426_v0, %v193_v51  ;;  %v262_v61 = vadd.f32 %v436_v1, %v226_v50  ;;  %v230_v62 = vmul.f32 %v426_v0, %v194_v54  ;;  %v204_v22 = vld [vmem:[%s431_s20 + $0xf0] sm:$0xff]  ;;  %v205_v25 = vld [vmem:[%s431_s20 + $0xf8] sm:$0xff] }
  0x19   : > { %284 = vst [vmem:[%s450_s25 + $0x30] sm:$0xff] %v252_v31  ;;  %v263_v2 = vadd.f32 %v436_v1, %v227_v53  ;;  %v231_v3 = vmul.f32 %v426_v0, %v195_v57  ;;  %v264_v5 = vadd.f32 %v436_v1, %v228_v56  ;;  %v232_v6 = vmul.f32 %v426_v0, %v196_v60 }
  0x1a   : > { %285 = vst [vmem:[%s450_s25 + $0x38] sm:$0xff] %v253_v34  ;;  %v265_v8 = vadd.f32 %v436_v1, %v229_v59  ;;  %v233_v9 = vmul.f32 %v426_v0, %v197_v63  ;;  %v266_v11 = vadd.f32 %v436_v1, %v230_v62  ;;  %v234_v12 = vmul.f32 %v426_v0, %v198_v4 }
  0x1b   : > { %286 = vst [vmem:[%s450_s25 + $0x40] sm:$0xff] %v254_v37  ;;  %v267_v14 = vadd.f32 %v436_v1, %v231_v3  ;;  %v235_v15 = vmul.f32 %v426_v0, %v199_v7  ;;  %v268_v17 = vadd.f32 %v436_v1, %v232_v6  ;;  %v236_v18 = vmul.f32 %v426_v0, %v200_v10 }
  0x1c   : > { %287 = vst [vmem:[%s450_s25 + $0x48] sm:$0xff] %v255_v40  ;;  %v269_v20 = vadd.f32 %v436_v1, %v233_v9  ;;  %v237_v21 = vmul.f32 %v426_v0, %v201_v13  ;;  %v270_v23 = vadd.f32 %v436_v1, %v234_v12  ;;  %v238_v24 = vmul.f32 %v426_v0, %v202_v16 }
  0x1d   : > { %288 = vst [vmem:[%s450_s25 + $0x50] sm:$0xff] %v256_v43  ;;  %v271_v26 = vadd.f32 %v436_v1, %v235_v15  ;;  %v239_v27 = vmul.f32 %v426_v0, %v203_v19  ;;  %v272_v28 = vadd.f32 %v436_v1, %v236_v18  ;;  %v240_v29 = vmul.f32 %v426_v0, %v204_v22 }
  0x1e   : > { %289 = vst [vmem:[%s450_s25 + $0x58] sm:$0xff] %v257_v46  ;;  %v273_v30 = vadd.f32 %v436_v1, %v237_v21  ;;  %v241_v31 = vmul.f32 %v426_v0, %v205_v25  ;;  %v274_v32 = vadd.f32 %v436_v1, %v238_v24 }
  0x1f   : > { %290 = vst [vmem:[%s450_s25 + $0x60] sm:$0xff] %v258_v49  ;;  %v275_v33 = vadd.f32 %v436_v1, %v239_v27  ;;  %v276_v34 = vadd.f32 %v436_v1, %v240_v29 }
  0x20   : > { %291 = vst [vmem:[%s450_s25 + $0x68] sm:$0xff] %v259_v52  ;;  %v277_v35 = vadd.f32 %v436_v1, %v241_v31 }
  0x21   : > { %292 = vst [vmem:[%s450_s25 + $0x70] sm:$0xff] %v260_v55 }
  0x22   : > { %293 = vst [vmem:[%s450_s25 + $0x78] sm:$0xff] %v261_v58 }
  0x23   : > { %294 = vst [vmem:[%s450_s25 + $0x80] sm:$0xff] %v262_v61 }
  0x24   : > { %295 = vst [vmem:[%s450_s25 + $0x88] sm:$0xff] %v263_v2 }
  0x25   : > { %296 = vst [vmem:[%s450_s25 + $0x90] sm:$0xff] %v264_v5 }
  0x26   : > { %297 = vst [vmem:[%s450_s25 + $0x98] sm:$0xff] %v265_v8 }
  0x27   : > { %298 = vst [vmem:[%s450_s25 + $0xa0] sm:$0xff] %v266_v11 }
  0x28   : > { %299 = vst [vmem:[%s450_s25 + $0xa8] sm:$0xff] %v267_v14 }
  0x29   : > { %300 = vst [vmem:[%s450_s25 + $0xb0] sm:$0xff] %v268_v17 }
  0x2a   : > { %301 = vst [vmem:[%s450_s25 + $0xb8] sm:$0xff] %v269_v20 }
  0x2b   : > { %302 = vst [vmem:[%s450_s25 + $0xc0] sm:$0xff] %v270_v23 }
  0x2c   : > { %303 = vst [vmem:[%s450_s25 + $0xc8] sm:$0xff] %v271_v26 }
  0x2d   : > { %304 = vst [vmem:[%s450_s25 + $0xd0] sm:$0xff] %v272_v28 }
  0x2e   : > { %305 = vst [vmem:[%s450_s25 + $0xd8] sm:$0xff] %v273_v30 }
  0x2f   : > { %306 = vst [vmem:[%s450_s25 + $0xe0] sm:$0xff] %v274_v32 }
  0x30   : > { %307 = vst [vmem:[%s450_s25 + $0xe8] sm:$0xff] %v275_v33 }
  0x31   : > { %308 = vst [vmem:[%s450_s25 + $0xf0] sm:$0xff] %v276_v34 }
  0x32   : > { %309 = vst [vmem:[%s450_s25 + $0xf8] sm:$0xff] %v277_v35 }
  0x33 PF: > { %s13_s12 = sadd.s32 1, %s393_s12  }
  0x34   : > { %p10_p4 = scmp.ge.s32.totalorder %s13_s12, 4  }
  0x36   :  { %12 = sbr.rel (!%p10_p4) target bundleno = 1 (0x1), region = 62 }

// kernel: residual_block_forward.11
= control target key start
LH: loop header
LB: loop body
LE: loop exit
PB: predicated region body
PF: predicated region fallthrough
CT: control target
= control target key end

     0   :  { %s579_s15 = smov 0   ;;  %s780_s0 = inlined_call_operand.vmem [shape: f32[512,128], index: 0, kind: input, shape index: {}]   ;;  %s781_s1 = inlined_call_operand.vmem [shape: f32[1,128], index: 1, kind: input, shape index: {}]   ;;  %s782_s2 = inlined_call_operand.vmem [shape: f32[1,128], index: 2, kind: input, shape index: {}]   ;;  %s783_s3 = inlined_call_operand.vmem [shape: f32[512,128], index: 3, kind: input, shape index: {}]   ;;  %s784_s4 = inlined_call_operand.vmem [shape: f32[512,128], index: 4, kind: output, shape index: {}]  }
   0x1 LB: > { %s523_s16 = sadd.s32 4294967295, %s552_s15   ;;  %p527_p0 = scmp.ge.s32.totalorder %s552_s15, 1  ;;  %s552_s15 = sphi %s579_s15, %s14_s15  }
   0x2   : > { %p174_p1 = scmp.lt.s32.totalorder %s552_s15, 3 }
   0x4   : > { %p175_p2 = pnand %p527_p0, %p174_p1 }
   0x5   : > { %s528_s17 = sshll.u32 (!%p175_p2), %s523_s16, 5 }
   0x6   : > { %178 = sbr.rel (%p175_p2) target bundleno = 55 (0x37), region = 36  ;;  %p206_p3 = scmp.lt.s32.totalorder (!%p175_p2), %s528_s17, 63 }
   0xb   : > { %s786_s17 = smov (!%p206_p3, %s528_s17), 63  ;;  %v590_v0 = vld [vmem:[%s781_s1] ss:$0 sm:$0xff] }
   0xc   : > { %s592_s20 = sshll.u32 %s786_s17, 3  ;;  %v609_v1 = vld [vmem:[%s782_s2] ss:$0 sm:$0xff] }
   0xd   : > { %s598_s23 = scalar_lea.vmem %s780_s0, %s592_s20  ;;  %s604_s26 = scalar_lea.vmem %s783_s3, %s592_s20 }
   0xe   : > { %v223_v2 = vld [vmem:[%s598_s23] sm:$0xff]  ;;  %v224_v3 = vld [vmem:[%s598_s23 + $0x8] sm:$0xff]  ;;  %v225_v7 = vld [vmem:[%s598_s23 + $0x10] sm:$0xff]  ;;  %s640_s5 = scalar_lea.vmem %s784_s4, %s592_s20 }
   0xf   : > { %v259_v4 = vmul.f32 %v590_v0, %v223_v2  ;;  %v327_v5 = vld [vmem:[%s604_s26] sm:$0xff]  ;;  %v260_v6 = vmul.f32 %v590_v0, %v224_v3  ;;  %v328_v8 = vld [vmem:[%s604_s26 + $0x8] sm:$0xff]  ;;  %v261_v9 = vmul.f32 %v590_v0, %v225_v7  ;;  %v226_v10 = vld [vmem:[%s598_s23 + $0x18] sm:$0xff] }
  0x10   : > { %v227_v11 = vld [vmem:[%s598_s23 + $0x20] sm:$0xff]  ;;  %v329_v14 = vld [vmem:[%s604_s26 + $0x10] sm:$0xff]  ;;  %v262_v15 = vmul.f32 %v590_v0, %v226_v10  ;;  %v330_v16 = vld [vmem:[%s604_s26 + $0x18] sm:$0xff] }
  0x11   : > { %v295_v12 = vadd.f32 %v609_v1, %v259_v4  ;;  %v296_v13 = vadd.f32 %v609_v1, %v260_v6  ;;  %v263_v17 = vmul.f32 %v590_v0, %v227_v11  ;;  %v228_v18 = vld [vmem:[%s598_s23 + $0x28] sm:$0xff]  ;;  %v297_v19 = vadd.f32 %v609_v1, %v261_v9  ;;  %v331_v20 = vld [vmem:[%s604_s26 + $0x20] sm:$0xff]  ;;  %v229_v22 = vld [vmem:[%s598_s23 + $0x30] sm:$0xff] }
  0x12   : > { %v264_v21 = vmul.f32 %v590_v0, %v228_v18  ;;  %v230_v23 = vld [vmem:[%s598_s23 + $0x38] sm:$0xff]  ;;  %v298_v26 = vadd.f32 %v609_v1, %v262_v15  ;;  %v332_v28 = vld [vmem:[%s604_s26 + $0x28] sm:$0xff]  ;;  %v265_v31 = vmul.f32 %v590_v0, %v229_v22  ;;  %v231_v33 = vld [vmem:[%s598_s23 + $0x40] sm:$0xff] }
  0x13   : > { %v359_v24 = vadd.f32 %v327_v5, %v295_v12  ;;  %v360_v25 = vadd.f32 %v328_v8, %v296_v13  ;;  %v299_v27 = vadd.f32 %v609_v1, %v263_v17  ;;  %v361_v29 = vadd.f32 %v329_v14, %v297_v19  ;;  %v232_v34 = vld [vmem:[%s598_s23 + $0x48] sm:$0xff]  ;;  %v333_v39 = vld [vmem:[%s604_s26 + $0x30] sm:$0xff]  ;;  %v334_v40 = vld [vmem:[%s604_s26 + $0x38] sm:$0xff] }
  0x14   : > { %v300_v30 = vadd.f32 %v609_v1, %v264_v21  ;;  %v266_v32 = vmul.f32 %v590_v0, %v230_v23  ;;  %v362_v37 = vadd.f32 %v330_v16, %v298_v26  ;;  %v233_v41 = vld [vmem:[%s598_s23 + $0x50] sm:$0xff]  ;;  %v301_v44 = vadd.f32 %v609_v1, %v265_v31  ;;  %v234_v46 = vld [vmem:[%s598_s23 + $0x58] sm:$0xff]  ;;  %v235_v47 = vld [vmem:[%s598_s23 + $0x60] sm:$0xff] }
  0x15   : > { %v391_v35 = vmax.f32 %v359_v24, 0.0  ;;  %v392_v36 = vmax.f32 %v360_v25, 0.0  ;;  %v363_v38 = vadd.f32 %v331_v20, %v299_v27  ;;  %v393_v42 = vmax.f32 %v361_v29, 0.0  ;;  %v236_v52 = vld [vmem:[%s598_s23 + $0x68] sm:$0xff]  ;;  %v335_v56 = vld [vmem:[%s604_s26 + $0x40] sm:$0xff]  ;;  %v337_v61 = vld [vmem:[%s604_s26 + $0x50] sm:$0xff] }
  0x16   : > { %v364_v43 = vadd.f32 %v332_v28, %v300_v30  ;;  %v302_v45 = vadd.f32 %v609_v1, %v266_v32  ;;  %v394_v48 = vmax.f32 %v362_v37, 0.0  ;;  %v267_v50 = vmul.f32 %v590_v0, %v231_v33  ;;  %v336_v57 = vld [vmem:[%s604_s26 + $0x48] sm:$0xff]  ;;  %v237_v2 = vld [vmem:[%s598_s23 + $0x70] sm:$0xff]  ;;  %v238_v3 = vld [vmem:[%s598_s23 + $0x78] sm:$0xff] }
  0x17   : > { %423 = vst [vmem:[%s640_s5] sm:$0xff] %v391_v35  ;;  %v395_v49 = vmax.f32 %v363_v38, 0.0  ;;  %v268_v51 = vmul.f32 %v590_v0, %v232_v34  ;;  %v365_v54 = vadd.f32 %v333_v39, %v301_v44  ;;  %v269_v58 = vmul.f32 %v590_v0, %v233_v41  ;;  %v338_v7 = vld [vmem:[%s604_s26 + $0x58] sm:$0xff]  ;;  %v339_v8 = vld [vmem:[%s604_s26 + $0x60] sm:$0xff]  ;;  %v340_v14 = vld [vmem:[%s604_s26 + $0x68] sm:$0xff] }
  0x18   : > { %424 = vst [vmem:[%s640_s5 + $0x8] sm:$0xff] %v392_v36  ;;  %v396_v53 = vmax.f32 %v364_v43, 0.0  ;;  %v366_v55 = vadd.f32 %v334_v40, %v302_v45  ;;  %v303_v59 = vadd.f32 %v609_v1, %v267_v50  ;;  %v270_v62 = vmul.f32 %v590_v0, %v234_v46  ;;  %v239_v19 = vld [vmem:[%s598_s23 + $0x80] sm:$0xff]  ;;  %v240_v20 = vld [vmem:[%s598_s23 + $0x88] sm:$0xff]  ;;  %v341_v25 = vld [vmem:[%s604_s26 + $0x70] sm:$0xff] }
  0x19   : > { %425 = vst [vmem:[%s640_s5 + $0x10] sm:$0xff] %v393_v42  ;;  %v304_v60 = vadd.f32 %v609_v1, %v268_v51  ;;  %v271_v63 = vmul.f32 %v590_v0, %v235_v47  ;;  %v397_v4 = vmax.f32 %v365_v54, 0.0  ;;  %v305_v6 = vadd.f32 %v609_v1, %v269_v58  ;;  %v342_v26 = vld [vmem:[%s604_s26 + $0x78] sm:$0xff]  ;;  %v241_v27 = vld [vmem:[%s598_s23 + $0x90] sm:$0xff]  ;;  %v243_v33 = vld [vmem:[%s598_s23 + $0xa0] sm:$0xff] }
  0x1a   : > { %426 = vst [vmem:[%s640_s5 + $0x18] sm:$0xff] %v394_v48  ;;  %v398_v5 = vmax.f32 %v366_v55, 0.0  ;;  %v272_v9 = vmul.f32 %v590_v0, %v236_v52  ;;  %v367_v10 = vadd.f32 %v335_v56, %v303_v59  ;;  %v306_v12 = vadd.f32 %v609_v1, %v270_v62  ;;  %v242_v32 = vld [vmem:[%s598_s23 + $0x98] sm:$0xff]  ;;  %v244_v38 = vld [vmem:[%s598_s23 + $0xa8] sm:$0xff]  ;;  %v343_v42 = vld [vmem:[%s604_s26 + $0x80] sm:$0xff] }
  0x1b   : > { %427 = vst [vmem:[%s640_s5 + $0x20] sm:$0xff] %v395_v49  ;;  %v368_v11 = vadd.f32 %v336_v57, %v304_v60  ;;  %v307_v13 = vadd.f32 %v609_v1, %v271_v63  ;;  %v369_v15 = vadd.f32 %v337_v61, %v305_v6  ;;  %v273_v17 = vmul.f32 %v590_v0, %v237_v2  ;;  %v344_v43 = vld [vmem:[%s604_s26 + $0x88] sm:$0xff]  ;;  %v345_v47 = vld [vmem:[%s604_s26 + $0x90] sm:$0xff]  ;;  %v246_v51 = vld [vmem:[%s598_s23 + $0xb8] sm:$0xff] }
  0x1c   : > { %428 = vst [vmem:[%s640_s5 + $0x28] sm:$0xff] %v396_v53  ;;  %v308_v16 = vadd.f32 %v609_v1, %v272_v9  ;;  %v274_v18 = vmul.f32 %v590_v0, %v238_v3  ;;  %v399_v21 = vmax.f32 %v367_v10, 0.0  ;;  %v370_v23 = vadd.f32 %v338_v7, %v306_v12  ;;  %v245_v50 = vld [vmem:[%s598_s23 + $0xb0] sm:$0xff]  ;;  %v346_v55 = vld [vmem:[%s604_s26 + $0x98] sm:$0xff]  ;;  %v347_v56 = vld [vmem:[%s604_s26 + $0xa0] sm:$0xff] }
  0x1d   : > { %429 = vst [vmem:[%s640_s5 + $0x30] sm:$0xff] %v397_v4  ;;  %v400_v22 = vmax.f32 %v368_v11, 0.0  ;;  %v371_v24 = vadd.f32 %v339_v8, %v307_v13  ;;  %v401_v28 = vmax.f32 %v369_v15, 0.0  ;;  %v309_v30 = vadd.f32 %v609_v1, %v273_v17  ;;  %v348_v62 = vld [vmem:[%s604_s26 + $0xa8] sm:$0xff]  ;;  %v349_v11 = vld [vmem:[%s604_s26 + $0xb0] sm:$0xff]  ;;  %v350_v12 = vld [vmem:[%s604_s26 + $0xb8] sm:$0xff] }
  0x1e   : > { %430 = vst [vmem:[%s640_s5 + $0x38] sm:$0xff] %v398_v5  ;;  %v372_v29 = vadd.f32 %v340_v14, %v308_v16  ;;  %v310_v31 = vadd.f32 %v609_v1, %v274_v18  ;;  %v402_v34 = vmax.f32 %v370_v23, 0.0  ;;  %v275_v36 = vmul.f32 %v590_v0, %v239_v19  ;;  %v247_v5 = vld [vmem:[%s598_s23 + $0xc0] sm:$0xff]  ;;  %v248_v6 = vld [vmem:[%s598_s23 + $0xc8] sm:$0xff]  ;;  %v249_v13 = vld [vmem:[%s598_s23 + $0xd0] sm:$0xff] }
  0x1f   : > { %431 = vst [vmem:[%s640_s5 + $0x40] sm:$0xff] %v399_v21  ;;  %v403_v35 = vmax.f32 %v371_v24, 0.0  ;;  %v276_v37 = vmul.f32 %v590_v0, %v240_v20  ;;  %v373_v40 = vadd.f32 %v341_v25, %v309_v30  ;;  %v277_v44 = vmul.f32 %v590_v0, %v241_v27  ;;  %v250_v18 = vld [vmem:[%s598_s23 + $0xd8] sm:$0xff]  ;;  %v251_v19 = vld [vmem:[%s598_s23 + $0xe0] sm:$0xff]  ;;  %v252_v24 = vld [vmem:[%s598_s23 + $0xe8] sm:$0xff] }
  0x20   : > { %432 = vst [vmem:[%s640_s5 + $0x48] sm:$0xff] %v400_v22  ;;  %v404_v39 = vmax.f32 %v372_v29, 0.0  ;;  %v374_v41 = vadd.f32 %v342_v26, %v310_v31  ;;  %v311_v45 = vadd.f32 %v609_v1, %v275_v36  ;;  %v278_v48 = vmul.f32 %v590_v0, %v242_v32  ;;  %v352_v29 = vld [vmem:[%s604_s26 + $0xc8] sm:$0xff]  ;;  %v253_v36 = vld [vmem:[%s598_s23 + $0xf0] sm:$0xff] }
  0x21   : > { %433 = vst [vmem:[%s640_s5 + $0x50] sm:$0xff] %v401_v28  ;;  %v312_v46 = vadd.f32 %v609_v1, %v276_v37  ;;  %v279_v49 = vmul.f32 %v590_v0, %v243_v33  ;;  %v405_v52 = vmax.f32 %v373_v40, 0.0  ;;  %v313_v54 = vadd.f32 %v609_v1, %v277_v44  ;;  %v351_v28 = vld [vmem:[%s604_s26 + $0xc0] sm:$0xff]  ;;  %v353_v33 = vld [vmem:[%s604_s26 + $0xd0] sm:$0xff]  ;;  %v254_v37 = vld [vmem:[%s598_s23 + $0xf8] sm:$0xff] }
  0x22   : > { %434 = vst [vmem:[%s640_s5 + $0x58] sm:$0xff] %v402_v34  ;;  %v406_v53 = vmax.f32 %v374_v41, 0.0  ;;  %v280_v57 = vmul.f32 %v590_v0, %v244_v38  ;;  %v375_v58 = vadd.f32 %v343_v42, %v311_v45  ;;  %v314_v60 = vadd.f32 %v609_v1, %v278_v48  ;;  %v354_v41 = vld [vmem:[%s604_s26 + $0xd8] sm:$0xff]  ;;  %v355_v42 = vld [vmem:[%s604_s26 + $0xe0] sm:$0xff]  ;;  %v356_v48 = vld [vmem:[%s604_s26 + $0xe8] sm:$0xff] }
  0x23   : > { %435 = vst [vmem:[%s640_s5 + $0x60] sm:$0xff] %v403_v35  ;;  %v376_v59 = vadd.f32 %v344_v43, %v312_v46  ;;  %v315_v61 = vadd.f32 %v609_v1, %v279_v49  ;;  %v377_v63 = vadd.f32 %v345_v47, %v313_v54  ;;  %v281_v3 = vmul.f32 %v590_v0, %v245_v50 }
  0x24   : > { %436 = vst [vmem:[%s640_s5 + $0x68] sm:$0xff] %v404_v39  ;;  %v316_v2 = vadd.f32 %v609_v1, %v280_v57  ;;  %v282_v4 = vmul.f32 %v590_v0, %v246_v51  ;;  %v407_v7 = vmax.f32 %v375_v58, 0.0  ;;  %v378_v9 = vadd.f32 %v346_v55, %v314_v60  ;;  %v357_v57 = vld [vmem:[%s604_s26 + $0xf0] sm:$0xff]  ;;  %v358_v58 = vld [vmem:[%s604_s26 + $0xf8] sm:$0xff] }
  0x25   : > { %437 = vst [vmem:[%s640_s5 + $0x70] sm:$0xff] %v405_v52  ;;  %v408_v8 = vmax.f32 %v376_v59, 0.0  ;;  %v379_v10 = vadd.f32 %v347_v56, %v315_v61  ;;  %v409_v14 = vmax.f32 %v377_v63, 0.0  ;;  %v317_v16 = vadd.f32 %v609_v1, %v281_v3 }
  0x26   : > { %438 = vst [vmem:[%s640_s5 + $0x78] sm:$0xff] %v406_v53  ;;  %v380_v15 = vadd.f32 %v348_v62, %v316_v2  ;;  %v318_v17 = vadd.f32 %v609_v1, %v282_v4  ;;  %v410_v20 = vmax.f32 %v378_v9, 0.0  ;;  %v283_v22 = vmul.f32 %v590_v0, %v247_v5 }
  0x27   : > { %439 = vst [vmem:[%s640_s5 + $0x80] sm:$0xff] %v407_v7  ;;  %v411_v21 = vmax.f32 %v379_v10, 0.0  ;;  %v284_v23 = vmul.f32 %v590_v0, %v248_v6  ;;  %v381_v26 = vadd.f32 %v349_v11, %v317_v16  ;;  %v285_v30 = vmul.f32 %v590_v0, %v249_v13 }
  0x28   : > { %440 = vst [vmem:[%s640_s5 + $0x88] sm:$0xff] %v408_v8  ;;  %v412_v25 = vmax.f32 %v380_v15, 0.0  ;;  %v382_v27 = vadd.f32 %v350_v12, %v318_v17  ;;  %v319_v31 = vadd.f32 %v609_v1, %v283_v22  ;;  %v286_v34 = vmul.f32 %v590_v0, %v250_v18 }
  0x29   : > { %441 = vst [vmem:[%s640_s5 + $0x90] sm:$0xff] %v409_v14  ;;  %v320_v32 = vadd.f32 %v609_v1, %v284_v23  ;;  %v287_v35 = vmul.f32 %v590_v0, %v251_v19  ;;  %v413_v38 = vmax.f32 %v381_v26, 0.0  ;;  %v321_v40 = vadd.f32 %v609_v1, %v285_v30 }
  0x2a   : > { %442 = vst [vmem:[%s640_s5 + $0x98] sm:$0xff] %v410_v20  ;;  %v414_v39 = vmax.f32 %v382_v27, 0.0  ;;  %v288_v43 = vmul.f32 %v590_v0, %v252_v24  ;;  %v383_v44 = vadd.f32 %v351_v28, %v319_v31  ;;  %v322_v46 = vadd.f32 %v609_v1, %v286_v34 }
  0x2b   : > { %443 = vst [vmem:[%s640_s5 + $0xa0] sm:$0xff] %v411_v21  ;;  %v384_v45 = vadd.f32 %v352_v29, %v320_v32  ;;  %v323_v47 = vadd.f32 %v609_v1, %v287_v35  ;;  %v385_v49 = vadd.f32 %v353_v33, %v321_v40  ;;  %v289_v51 = vmul.f32 %v590_v0, %v253_v36 }
  0x2c   : > { %444 = vst [vmem:[%s640_s5 + $0xa8] sm:$0xff] %v412_v25  ;;  %v324_v50 = vadd.f32 %v609_v1, %v288_v43  ;;  %v290_v52 = vmul.f32 %v590_v0, %v254_v37  ;;  %v415_v53 = vmax.f32 %v383_v44, 0.0  ;;  %v386_v55 = vadd.f32 %v354_v41, %v322_v46 }
  0x2d   : > { %445 = vst [vmem:[%s640_s5 + $0xb0] sm:$0xff] %v413_v38  ;;  %v416_v54 = vmax.f32 %v384_v45, 0.0  ;;  %v387_v56 = vadd.f32 %v355_v42, %v323_v47  ;;  %v417_v59 = vmax.f32 %v385_v49, 0.0  ;;  %v325_v61 = vadd.f32 %v609_v1, %v289_v51 }
  0x2e   : > { %446 = vst [vmem:[%s640_s5 + $0xb8] sm:$0xff] %v414_v39  ;;  %v388_v60 = vadd.f32 %v356_v48, %v324_v50  ;;  %v326_v0 = vadd.f32 %v609_v1, %v290_v52  ;;  %v418_v62 = vmax.f32 %v386_v55, 0.0 }
  0x2f   : > { %447 = vst [vmem:[%s640_s5 + $0xc0] sm:$0xff] %v415_v53  ;;  %v419_v63 = vmax.f32 %v387_v56, 0.0  ;;  %v389_v3 = vadd.f32 %v357_v57, %v325_v61 }
  0x30   : > { %448 = vst [vmem:[%s640_s5 + $0xc8] sm:$0xff] %v416_v54  ;;  %v420_v2 = vmax.f32 %v388_v60, 0.0  ;;  %v390_v4 = vadd.f32 %v358_v58, %v326_v0 }
  0x31   : > { %449 = vst [vmem:[%s640_s5 + $0xd0] sm:$0xff] %v417_v59  ;;  %v421_v5 = vmax.f32 %v389_v3, 0.0 }
  0x32   : > { %450 = vst [vmem:[%s640_s5 + $0xd8] sm:$0xff] %v418_v62  ;;  %v422_v6 = vmax.f32 %v390_v4, 0.0 }
  0x33   : > { %451 = vst [vmem:[%s640_s5 + $0xe0] sm:$0xff] %v419_v63 }
  0x34   : > { %452 = vst [vmem:[%s640_s5 + $0xe8] sm:$0xff] %v420_v2 }
  0x35   : > { %453 = vst [vmem:[%s640_s5 + $0xf0] sm:$0xff] %v421_v5 }
  0x36   : > { %454 = vst [vmem:[%s640_s5 + $0xf8] sm:$0xff] %v422_v6 }
  0x37 PF: > { %s14_s15 = sadd.s32 1, %s552_s15  }
  0x38   : > { %p11_p4 = scmp.ge.s32.totalorder %s14_s15, 4  }
  0x3a   :  { %13 = sbr.rel (!%p11_p4) target bundleno = 1 (0x1), region = 69 }

</bundles_post_ra>
